<compile_context>
chip_gen: v7x
topology: tpu7x:2x2x1
jax: 0.10.0
libtpu: 0.0.40
codegen_flags: <defaults>
</compile_context>

<pallas_src>
import functools

import jax
import jax.numpy as jnp
from jax.experimental import pallas as pl
from jax.experimental.pallas import tpu as pltpu

INPUT_DIM = 4
HIDDEN_DIM = 128   # matches the PyTorch module (hidden_dim = 128)
NUM_LAYERS = 3     # 1 input layer + (num_layers-1) hidden layers + head


def _round_up(n, m):
    return ((n + m - 1) // m) * m


def _softplus(z):
    # PyTorch nn.Softplus (beta=1): log(1 + exp(z)), numerically stable form.
    return jnp.logaddexp(jnp.zeros_like(z), z)


def neural_sde_kernel(x_ref, w0_ref, w1_ref, w2_ref, wo_ref, bh_ref, bo_ref,
                      drift_ref, diff_ref):
    # x_ref:   [D, Bt]         (batch on the lane axis)
    # w0_ref:  [2H, D]         (drift W0^T stacked on diffusion W0^T)
    # w1_ref:  [2H, 2H]        block-diagonal (drift | diffusion)
    # w2_ref:  [2H, 2H]        block-diagonal
    # wo_ref:  [2, 2H]         block-structured head -> row0 drift, row1 diff
    # bh_ref:  [2H, 3]         hidden biases, one column per layer
    # bo_ref:  [2, 1]          head biases
    x = x_ref[...]

    h = jnp.maximum(
        jnp.dot(w0_ref[...], x, preferred_element_type=jnp.float32)
        + bh_ref[:, 0:1], 0.0)
    h = jnp.maximum(
        jnp.dot(w1_ref[...], h, preferred_element_type=jnp.float32)
        + bh_ref[:, 1:2], 0.0)
    h = jnp.maximum(
        jnp.dot(w2_ref[...], h, preferred_element_type=jnp.float32)
        + bh_ref[:, 2:3], 0.0)
    out = (jnp.dot(wo_ref[...], h, preferred_element_type=jnp.float32)
           + bo_ref[...])                                     # [2, Bt]

    drift_ref[...] = out[0:1, :].astype(drift_ref.dtype)
    diff_ref[...] = _softplus(out[1:2, :]).astype(diff_ref.dtype)


def init_params(key, input_dim, hidden_dim, num_layers):
    """Synthetic nn.Linear-style params for one MLP head.

    Returns (W0, b0, W1, b1, W2, b2, Wout, bout) with W stored [in, out]
    and b stored [out] (1-D), mirroring the PyTorch layer stack.
    """
    dims = ([(input_dim, hidden_dim)]
            + [(hidden_dim, hidden_dim)] * (num_layers - 1)
            + [(hidden_dim, 1)])
    params = []
    for fi, fo in dims:
        key, kw, kb = jax.random.split(key, 3)
        scale = 1.0 / jnp.sqrt(jnp.float32(fi))
        w = jax.random.uniform(kw, (fi, fo), jnp.float32, -scale, scale)
        b = jax.random.uniform(kb, (fo,), jnp.float32, -scale, scale)
        params += [w, b]
    return tuple(params)


def _block_diag(a, b):
    za = jnp.zeros((a.shape[0], b.shape[1]), a.dtype)
    zb = jnp.zeros((b.shape[0], a.shape[1]), a.dtype)
    return jnp.concatenate(
        [jnp.concatenate([a, za], axis=1),
         jnp.concatenate([zb, b], axis=1)], axis=0)


def _fuse_params(drift_params, diff_params):
    """Pack the two 4-layer MLPs into one transposed, block-diagonal chain."""
    wd0, bd0, wd1, bd1, wd2, bd2, wdo, bdo = drift_params
    wg0, bg0, wg1, bg1, wg2, bg2, wgo, bgo = diff_params

    w0_f = jnp.concatenate([wd0.T, wg0.T], axis=0)        # [2H, D]
    w1_f = _block_diag(wd1.T, wg1.T)                      # [2H, 2H]
    w2_f = _block_diag(wd2.T, wg2.T)                      # [2H, 2H]
    wo_f = _block_diag(wdo.T, wgo.T)                      # [2, 2H]

    bh = jnp.stack([jnp.concatenate([bd0, bg0]),
                    jnp.concatenate([bd1, bg1]),
                    jnp.concatenate([bd2, bg2])], axis=1)  # [2H, 3]
    bo = jnp.concatenate([bdo, bgo]).reshape(2, 1)         # [2, 1]
    return w0_f, w1_f, w2_f, wo_f, bh, bo


@functools.partial(jax.jit, static_argnames=("block_b",))
def neural_sde_forward(x, drift_params, diff_params, *, block_b=1024):
    """x: [B, input_dim] -> (drift [B, 1], diffusion [B, 1])."""
    assert block_b % 128 == 0, "batch tile must be lane-dense (multiple of 128)"
    B, D = x.shape
    H2 = 2 * drift_params[0].shape[1]                      # 2 * hidden_dim

    w0_f, w1_f, w2_f, wo_f, bh, bo = _fuse_params(drift_params, diff_params)

    # Transpose so batch is on the lane axis; pad batch to a multiple of the tile.
    bt = max(128, min(block_b, _round_up(B, 128)))
    b_pad = _round_up(B, bt)
    x_t = x.T.astype(jnp.float32)                          # [D, B]
    if b_pad != B:
        x_t = jnp.pad(x_t, ((0, 0), (0, b_pad - B)))

    grid = (b_pad // bt,)
    full = lambda shape: pl.BlockSpec(shape, lambda i: (0, 0))
    in_specs = [
        pl.BlockSpec((D, bt), lambda i: (0, i)),           # x_t (tiled over batch)
        full((H2, D)),                                     # w0_f
        full((H2, H2)),                                    # w1_f
        full((H2, H2)),                                    # w2_f
        full((2, H2)),                                     # wo_f
        full((H2, 3)),                                     # bh
        full((2, 1)),                                      # bo
    ]
    out_specs = [pl.BlockSpec((1, bt), lambda i: (0, i)),
                 pl.BlockSpec((1, bt), lambda i: (0, i))]
    out_shape = (jax.ShapeDtypeStruct((1, b_pad), jnp.float32),
                 jax.ShapeDtypeStruct((1, b_pad), jnp.float32))

    drift_t, diff_t = pl.pallas_call(
        neural_sde_kernel,
        out_shape=out_shape,
        grid=grid,
        in_specs=in_specs,
        out_specs=out_specs,
        compiler_params=pltpu.CompilerParams(
            dimension_semantics=("parallel",)),
    )(x_t, w0_f, w1_f, w2_f, wo_f, bh, bo)

    drift = drift_t[:, :B].T                               # [B, 1]
    diffusion = diff_t[:, :B].T                            # [B, 1]
    return drift, diffusion


def reference_forward(x, drift_params, diff_params):
    def mlp(x, p):
        w0, b0, w1, b1, w2, b2, wo, bo = p
        h = jnp.maximum(x @ w0 + b0, 0.0)
        h = jnp.maximum(h @ w1 + b1, 0.0)
        h = jnp.maximum(h @ w2 + b2, 0.0)
        return h @ wo + bo
    drift = mlp(x, drift_params)
    diffusion = jax.nn.softplus(mlp(x, diff_params))
    return drift, diffusion


if __name__ == "__main__":
    key = jax.random.PRNGKey(0)
    kx, kd, kg = jax.random.split(key, 3)

    B = 256  # two 128-lane tiles -> grid=(2,) so both v7x TensorCores get work
    x = jax.random.normal(kx, (B, INPUT_DIM), jnp.float32)

    drift_params = init_params(kd, INPUT_DIM, HIDDEN_DIM, NUM_LAYERS)
    diff_params = init_params(kg, INPUT_DIM, HIDDEN_DIM, NUM_LAYERS)

    drift, diffusion = neural_sde_forward(x, drift_params, diff_params,
                                          block_b=128)
    jax.block_until_ready((drift, diffusion))

    # Sanity check against a pure-JAX reference.
    drift_r, diff_r = reference_forward(x, drift_params, diff_params)
    assert drift.shape == (B, 1) and diffusion.shape == (B, 1)
    assert jnp.allclose(drift, drift_r, atol=1e-4, rtol=1e-4)
    assert jnp.allclose(diffusion, diff_r, atol=1e-4, rtol=1e-4)

    print("KERNEL_OK")
</pallas_src>

<mosaic_0001>
module attributes {stable_mosaic.version = 11 : i64} {
  func.func @neural_sde_kernel(%arg0: i32, %arg1: memref<4x128xf32, #tpu.memory_space<vmem>>, %arg2: memref<256x4xf32, #tpu.memory_space<vmem>>, %arg3: memref<256x256xf32, #tpu.memory_space<vmem>>, %arg4: memref<256x256xf32, #tpu.memory_space<vmem>>, %arg5: memref<2x256xf32, #tpu.memory_space<vmem>>, %arg6: memref<256x3xf32, #tpu.memory_space<vmem>>, %arg7: memref<2x1xf32, #tpu.memory_space<vmem>>, %arg8: memref<1x128xf32, #tpu.memory_space<vmem>>, %arg9: memref<1x128xf32, #tpu.memory_space<vmem>>) attributes {dimension_semantics = [#tpu.dimension_semantics<parallel>], iteration_bounds = array<i64: 2>, scalar_prefetch = 0 : i64, scratch_operands = 0 : i64, tpu.core_type = #tpu.core_type<tc>, window_params = [{transform_indices = @transform_0, window_bounds = array<i64: 4, 128>}, {pipeline_mode = #tpu.pipeline_mode<synchronous>, transform_indices = @transform_1, window_bounds = array<i64: 256, 4>}, {pipeline_mode = #tpu.pipeline_mode<synchronous>, transform_indices = @transform_2, window_bounds = array<i64: 256, 256>}, {pipeline_mode = #tpu.pipeline_mode<synchronous>, transform_indices = @transform_3, window_bounds = array<i64: 256, 256>}, {pipeline_mode = #tpu.pipeline_mode<synchronous>, transform_indices = @transform_4, window_bounds = array<i64: 2, 256>}, {pipeline_mode = #tpu.pipeline_mode<synchronous>, transform_indices = @transform_5, window_bounds = array<i64: 256, 3>}, {pipeline_mode = #tpu.pipeline_mode<synchronous>, transform_indices = @transform_6, window_bounds = array<i64: 2, 1>}, {transform_indices = @transform_7, window_bounds = array<i64: 1, 128>}, {transform_indices = @transform_8, window_bounds = array<i64: 1, 128>}]} {
    %c0 = arith.constant 0 : index
    %c0_0 = arith.constant 0 : index
    %0 = vector.load %arg1[%c0, %c0_0] : memref<4x128xf32, #tpu.memory_space<vmem>>, vector<4x128xf32>
    %c0_1 = arith.constant 0 : index
    %c0_2 = arith.constant 0 : index
    %1 = vector.load %arg2[%c0_1, %c0_2] : memref<256x4xf32, #tpu.memory_space<vmem>>, vector<256x4xf32>
    %cst = arith.constant dense<0.000000e+00> : vector<256x128xf32>
    %2 = tpu.matmul %1, %0, %cst {dimension_numbers = #tpu.dot_dimension_numbers<[1], [0], [0], [1], [0, 0, 1, 1], [], []>} : vector<256x4xf32>, vector<4x128xf32>, vector<256x128xf32> -> vector<256x128xf32>
    %c0_3 = arith.constant 0 : index
    %c0_4 = arith.constant 0 : index
    %3 = vector.load %arg6[%c0_3, %c0_4] : memref<256x3xf32, #tpu.memory_space<vmem>>, vector<256x1xf32>
    %4 = vector.broadcast %3 : vector<256x1xf32> to vector<256x128xf32>
    %5 = arith.addf %2, %4 : vector<256x128xf32>
    %cst_5 = arith.constant 0.000000e+00 : f32
    %6 = vector.broadcast %cst_5 : f32 to vector<256x128xf32>
    %7 = arith.maximumf %5, %6 : vector<256x128xf32>
    %c0_6 = arith.constant 0 : index
    %c0_7 = arith.constant 0 : index
    %8 = vector.load %arg3[%c0_6, %c0_7] : memref<256x256xf32, #tpu.memory_space<vmem>>, vector<256x256xf32>
    %cst_8 = arith.constant dense<0.000000e+00> : vector<256x128xf32>
    %9 = tpu.matmul %8, %7, %cst_8 {dimension_numbers = #tpu.dot_dimension_numbers<[1], [0], [0], [1], [0, 0, 1, 1], [], []>} : vector<256x256xf32>, vector<256x128xf32>, vector<256x128xf32> -> vector<256x128xf32>
    %c0_9 = arith.constant 0 : index
    %c1 = arith.constant 1 : index
    %10 = vector.load %arg6[%c0_9, %c1] : memref<256x3xf32, #tpu.memory_space<vmem>>, vector<256x1xf32>
    %11 = vector.broadcast %10 : vector<256x1xf32> to vector<256x128xf32>
    %12 = arith.addf %9, %11 : vector<256x128xf32>
    %cst_10 = arith.constant 0.000000e+00 : f32
    %13 = vector.broadcast %cst_10 : f32 to vector<256x128xf32>
    %14 = arith.maximumf %12, %13 : vector<256x128xf32>
    %c0_11 = arith.constant 0 : index
    %c0_12 = arith.constant 0 : index
    %15 = vector.load %arg4[%c0_11, %c0_12] : memref<256x256xf32, #tpu.memory_space<vmem>>, vector<256x256xf32>
    %cst_13 = arith.constant dense<0.000000e+00> : vector<256x128xf32>
    %16 = tpu.matmul %15, %14, %cst_13 {dimension_numbers = #tpu.dot_dimension_numbers<[1], [0], [0], [1], [0, 0, 1, 1], [], []>} : vector<256x256xf32>, vector<256x128xf32>, vector<256x128xf32> -> vector<256x128xf32>
    %c0_14 = arith.constant 0 : index
    %c2 = arith.constant 2 : index
    %17 = vector.load %arg6[%c0_14, %c2] : memref<256x3xf32, #tpu.memory_space<vmem>>, vector<256x1xf32>
    %18 = vector.broadcast %17 : vector<256x1xf32> to vector<256x128xf32>
    %19 = arith.addf %16, %18 : vector<256x128xf32>
    %cst_15 = arith.constant 0.000000e+00 : f32
    %20 = vector.broadcast %cst_15 : f32 to vector<256x128xf32>
    %21 = arith.maximumf %19, %20 : vector<256x128xf32>
    %c0_16 = arith.constant 0 : index
    %c0_17 = arith.constant 0 : index
    %22 = vector.load %arg5[%c0_16, %c0_17] : memref<2x256xf32, #tpu.memory_space<vmem>>, vector<2x256xf32>
    %cst_18 = arith.constant dense<0.000000e+00> : vector<2x128xf32>
    %23 = tpu.matmul %22, %21, %cst_18 {dimension_numbers = #tpu.dot_dimension_numbers<[1], [0], [0], [1], [0, 0, 1, 1], [], []>} : vector<2x256xf32>, vector<256x128xf32>, vector<2x128xf32> -> vector<2x128xf32>
    %c0_19 = arith.constant 0 : index
    %c0_20 = arith.constant 0 : index
    %24 = vector.load %arg7[%c0_19, %c0_20] : memref<2x1xf32, #tpu.memory_space<vmem>>, vector<2x1xf32>
    %25 = vector.broadcast %24 : vector<2x1xf32> to vector<2x128xf32>
    %26 = arith.addf %23, %25 : vector<2x128xf32>
    %27 = vector.extract_strided_slice %26 {offsets = [0, 0], sizes = [1, 128], strides = [1, 1]} : vector<2x128xf32> to vector<1x128xf32>
    %c0_21 = arith.constant 0 : index
    %c0_22 = arith.constant 0 : index
    %28 = vector.load %arg8[%c0_21, %c0_22] : memref<1x128xf32, #tpu.memory_space<vmem>>, vector<1x128xf32>
    tpu.vector_store %arg8[%c0_21, %c0_22], %27 {strides = array<i32>} : memref<1x128xf32, #tpu.memory_space<vmem>>, vector<1x128xf32>,
    %29 = vector.extract_strided_slice %26 {offsets = [1, 0], sizes = [1, 128], strides = [1, 1]} : vector<2x128xf32> to vector<1x128xf32>
    %cst_23 = arith.constant 0.000000e+00 : f32
    %30 = vector.broadcast %cst_23 : f32 to vector<1x128xf32>
    %31 = arith.maximumf %30, %29 : vector<1x128xf32>
    %32 = arith.subf %30, %29 : vector<1x128xf32>
    %33 = arith.cmpf one, %32, %32 : vector<1x128xf32>
    %34 = arith.addf %30, %29 : vector<1x128xf32>
    %35 = math.absf %32 : vector<1x128xf32>
    %cst_24 = arith.constant 0.000000e+00 : f32
    %36 = vector.broadcast %cst_24 : f32 to vector<1x128xf32>
    %37 = arith.subf %36, %35 : vector<1x128xf32>
    %38 = math.exp %37 : vector<1x128xf32>
    %39 = math.log1p %38 : vector<1x128xf32>
    %40 = arith.addf %31, %39 : vector<1x128xf32>
    %41 = arith.select %33, %34, %40 : vector<1x128xi1>, vector<1x128xf32>
    %c0_25 = arith.constant 0 : index
    %c0_26 = arith.constant 0 : index
    %42 = vector.load %arg9[%c0_25, %c0_26] : memref<1x128xf32, #tpu.memory_space<vmem>>, vector<1x128xf32>
    tpu.vector_store %arg9[%c0_25, %c0_26], %41 {strides = array<i32>} : memref<1x128xf32, #tpu.memory_space<vmem>>, vector<1x128xf32>,
    return
  }
  func.func @transform_0(%arg0: i32) -> (i32, i32) {
    %c0_i32 = arith.constant 0 : i32
    %c0_i32_0 = arith.constant 0 : i32
    return %c0_i32, %arg0 : i32, i32
  }
  func.func @transform_1(%arg0: i32) -> (i32, i32) {
    %c0_i32 = arith.constant 0 : i32
    %c0_i32_0 = arith.constant 0 : i32
    %c0_i32_1 = arith.constant 0 : i32
    return %c0_i32, %c0_i32_0 : i32, i32
  }
  func.func @transform_2(%arg0: i32) -> (i32, i32) {
    %c0_i32 = arith.constant 0 : i32
    %c0_i32_0 = arith.constant 0 : i32
    %c0_i32_1 = arith.constant 0 : i32
    return %c0_i32, %c0_i32_0 : i32, i32
  }
  func.func @transform_3(%arg0: i32) -> (i32, i32) {
    %c0_i32 = arith.constant 0 : i32
    %c0_i32_0 = arith.constant 0 : i32
    %c0_i32_1 = arith.constant 0 : i32
    return %c0_i32, %c0_i32_0 : i32, i32
  }
  func.func @transform_4(%arg0: i32) -> (i32, i32) {
    %c0_i32 = arith.constant 0 : i32
    %c0_i32_0 = arith.constant 0 : i32
    %c0_i32_1 = arith.constant 0 : i32
    return %c0_i32, %c0_i32_0 : i32, i32
  }
  func.func @transform_5(%arg0: i32) -> (i32, i32) {
    %c0_i32 = arith.constant 0 : i32
    %c0_i32_0 = arith.constant 0 : i32
    %c0_i32_1 = arith.constant 0 : i32
    return %c0_i32, %c0_i32_0 : i32, i32
  }
  func.func @transform_6(%arg0: i32) -> (i32, i32) {
    %c0_i32 = arith.constant 0 : i32
    %c0_i32_0 = arith.constant 0 : i32
    %c0_i32_1 = arith.constant 0 : i32
    return %c0_i32, %c0_i32_0 : i32, i32
  }
  func.func @transform_7(%arg0: i32) -> (i32, i32) {
    %c0_i32 = arith.constant 0 : i32
    %c0_i32_0 = arith.constant 0 : i32
    return %c0_i32, %arg0 : i32, i32
  }
  func.func @transform_8(%arg0: i32) -> (i32, i32) {
    %c0_i32 = arith.constant 0 : i32
    %c0_i32_0 = arith.constant 0 : i32
    return %c0_i32, %arg0 : i32, i32
  }
}

</mosaic_0001>

<bundles_post_ra>
// kernel: neural_sde_forward.1
= control target key start
LH: loop header
LB: loop body
LE: loop exit
PB: predicated region body
PF: predicated region fallthrough
CT: control target
= control target key end

     0   :  { %14 = vsyncpa [#allocation3], 0  ;;  %s3628_s0 = inlined_call_operand.vmem [shape: f32[4,256], index: 0, kind: input, shape index: {}]   ;;  %s3629_s1 = inlined_call_operand.vmem [shape: f32[256,4], index: 1, kind: input, shape index: {}]   ;;  %s3630_s2 = inlined_call_operand.vmem [shape: f32[256,256], index: 2, kind: input, shape index: {}]   ;;  %s3631_s3 = inlined_call_operand.vmem [shape: f32[256,256], index: 3, kind: input, shape index: {}]   ;;  %s3632_s4 = inlined_call_operand.vmem [shape: f32[2,256], index: 4, kind: input, shape index: {}]   ;;  %s3633_s5 = inlined_call_operand.vmem [shape: f32[256,3], index: 5, kind: input, shape index: {}]   ;;  %s3634_s6 = inlined_call_operand.vmem [shape: f32[2,1], index: 6, kind: input, shape index: {}]   ;;  %s3635_s7 = inlined_call_operand.hbm [shape: f32[1,256], index: 7, kind: output, shape index: {0}]   ;;  %s3636_s8 = inlined_call_operand.hbm [shape: f32[1,256], index: 8, kind: output, shape index: {1}]  }
   0x1   :  { %16 = vsyncpa [#allocation3 + $0x1], 0 }
   0x2   :  { %17 = vsyncpa [#allocation5], 0 }
   0x3   :  { %19 = vsyncpa [#allocation5 + $0x1], 0  ;;  %s2540_s27 = smov 0   ;;  %s2542_s28 = smov 0  }
   0x4   :  { %s2544_s29 = smov 0   ;;  %s2546_s30 = smov 0  }
   0x5 LB: > { %s2561_s9 = sadd.s32 4294967295, %s2487_s30   ;;  %s2013_s10 = sadd.s32 4294967294, %s2487_s30   ;;  %s2487_s30 = sphi %s2546_s30, %s3642_s30   ;;  %s2483_s29 = sphi %s2544_s29, %s3641_s29   ;;  %s2479_s28 = sphi %s2542_s28, %s3640_s28   ;;  %s2475_s27 = sphi %s2540_s27, %s3639_s27  }
   0x6   : > { %s2565_s11 = sadd.s32 1, %s2487_s30   ;;  %s184_s12 = sadd.s32 1, %s2483_s29 }
   0x7   : > { %s181_s13 = ssub.s32 %s2487_s30, %s2565_s11  ;;  %p194_p0 = scmp.ne.s32.totalorder %s2483_s29, %s2479_s28 }
   0x8   : > { %p182_p1 = scmp.eq.s32.totalorder %s181_s13, 0  ;;  %p195_p2 = scmp.eq.s32.totalorder %s2561_s9, 1 }
   0x9   : > { %p200_p3 = scmp.ne.s32.totalorder %s2479_s28, %s2475_s27  ;;  %p201_p4 = scmp.eq.s32.totalorder %s2013_s10, 1 }
   0xa   : > { %s2576_s14 = scalar_select %p182_p1, %s2483_s29, %s184_s12  }
   0xb   : > { %p2578_p5 = por %p195_p2, %p194_p0  ;;  %p2582_p6 = por %p201_p4, %p200_p3 }
   0xc   : > { %p2016_p7 = scmp.ge.s32.totalorder %s2487_s30, 1  ;;  %p270_p8 = scmp.lt.s32.totalorder %s2487_s30, 3 }
   0xe   : > { %p271_p9 = pnand %p2016_p7, %p270_p8 }
   0xf   : > { %p306_p10 = scmp.lt.s32.totalorder (!%p271_p9), %s2561_s9, 1  ;;  %v311_v0 = vld [vmem:[%s3629_s1] sm:$0xff] (!%p271_p9)  ;;  %vm535_vm0 = vcmask (!%p271_p9), 31744   ;;  %v2489_v1 = vmov (!%p271_p9), 0   ;;  %vm632_vm1 = vcmask (!%p271_p9), 1043456   ;;  %v2608_v3 = vld [vmem:[%s3633_s5 + $0x10] sm:$0xff] (!%p271_p9) }
  0x10   : > { %274 = sbr.rel (%p271_p9) target bundleno = 1283 (0x503), region = 48  ;;  %2126 = vmatprep.mubr.msk.f32.mxu0 (!%p271_p9), %vm535_vm0, %v311_v0  ;;  %2350 = vset.pattern.permute.xlu0 (!%p271_p9), %v2489_v1  ;;  %v2599_v2 = vld [vmem:[%s3633_s5] sm:$0xff] (!%p271_p9)  ;;  %v312_v5 = vld [vmem:[%s3629_s1 + $0x8] sm:$0xff] (!%p271_p9)  ;;  %v313_v7 = vld [vmem:[%s3629_s1 + $0x10] sm:$0xff] (!%p271_p9)  ;;  %s2493_s12 = smov (!%p271_p9), [#allocation2]  }
  0x11   : > { %2351 = vset.pattern.permute.xlu1 (!%p271_p9), %v2489_v1  ;;  %377 = vperm.xlu0 (!%p271_p9), %2350, %v2599_v2   ;;  %v2617_v6 = vld [vmem:[%s3633_s5 + $0x8] sm:$0xff] (!%p271_p9)  ;;  %v2625_v8 = vld [vmem:[%s3633_s5 + $0x18] sm:$0xff] (!%p271_p9)  ;;  %v2637_v10 = vld [vmem:[%s3633_s5 + $0x20] sm:$0xff] (!%p271_p9)  ;;  %s2397_s13 = sshll.u32 (!%p271_p9), %s2493_s12, 4  ;;  %s2398_s13 = int_to_ptr.vmem [resolvable:$false] %s2397_s13 }
  0x12   : > { %387 = vperm.xlu1 (!%p271_p9), %2351, %v2608_v3   ;;  %v314_v9 = vld [vmem:[%s3629_s1 + $0x18] sm:$0xff] (!%p271_p9)  ;;  %v315_v11 = vld [vmem:[%s3629_s1 + $0x20] sm:$0xff] (!%p271_p9)  ;;  %v2645_v12 = vld [vmem:[%s3633_s5 + $0x28] sm:$0xff] (!%p271_p9)  ;;  %s2399_s17 = scalar_lea.vmem (!%p271_p9), %s2398_s13, 32 }
  0x13   : > { %v316_v13 = vld [vmem:[%s3629_s1 + $0x28] sm:$0xff] (!%p271_p9)  ;;  %v2657_v14 = vld [vmem:[%s3633_s5 + $0x30] sm:$0xff] (!%p271_p9)  ;;  %v2665_v16 = vld [vmem:[%s3633_s5 + $0x38] sm:$0xff] (!%p271_p9) }
  0x14   : > { %v317_v15 = vld [vmem:[%s3629_s1 + $0x30] sm:$0xff] (!%p271_p9)  ;;  %v318_v17 = vld [vmem:[%s3629_s1 + $0x38] sm:$0xff] (!%p271_p9)  ;;  %v2677_v18 = vld [vmem:[%s3633_s5 + $0x40] sm:$0xff] (!%p271_p9) }
  0x15   : > { %382 = vperm.xlu0 (!%p271_p9), %2350, %v2617_v6   ;;  %v319_v19 = vld [vmem:[%s3629_s1 + $0x40] sm:$0xff] (!%p271_p9)  ;;  %v2685_v20 = vld [vmem:[%s3633_s5 + $0x48] sm:$0xff] (!%p271_p9)  ;;  %v2697_v22 = vld [vmem:[%s3633_s5 + $0x50] sm:$0xff] (!%p271_p9) }
  0x16   : > { %392 = vperm.xlu1 (!%p271_p9), %2351, %v2625_v8   ;;  %v320_v21 = vld [vmem:[%s3629_s1 + $0x48] sm:$0xff] (!%p271_p9)  ;;  %v321_v23 = vld [vmem:[%s3629_s1 + $0x50] sm:$0xff] (!%p271_p9)  ;;  %v2705_v24 = vld [vmem:[%s3633_s5 + $0x58] sm:$0xff] (!%p271_p9) }
  0x17   : > { %s307_s19 = scalar_select %p306_p10, %s2561_s9, 1  ;;  %v322_v25 = vld [vmem:[%s3629_s1 + $0x58] sm:$0xff]  ;;  %v2717_v26 = vld [vmem:[%s3633_s5 + $0x60] sm:$0xff]  ;;  %v2725_v28 = vld [vmem:[%s3633_s5 + $0x68] sm:$0xff] }
  0x18   : > { %v323_v27 = vld [vmem:[%s3629_s1 + $0x60] sm:$0xff]  ;;  %v324_v29 = vld [vmem:[%s3629_s1 + $0x68] sm:$0xff]  ;;  %v2737_v30 = vld [vmem:[%s3633_s5 + $0x70] sm:$0xff] }
  0x19   : > { %s2017_s20 = sshll.u32 %s307_s19, 2  ;;  %397 = vperm.xlu0 %2350, %v2637_v10   ;;  %v325_v31 = vld [vmem:[%s3629_s1 + $0x70] sm:$0xff]  ;;  %v2745_v32 = vld [vmem:[%s3633_s5 + $0x78] sm:$0xff]  ;;  %v2757_v34 = vld [vmem:[%s3633_s5 + $0x80] sm:$0xff]  ;;  %s3544_s19 = sand.u32 1, %s2479_s28  }
  0x1a   : > { %s309_s25 = scalar_lea.vmem %s3628_s0, %s2017_s20  ;;  %402 = vperm.xlu1 %2351, %v2645_v12   ;;  %v326_v33 = vld [vmem:[%s3629_s1 + $0x78] sm:$0xff]  ;;  %v327_v35 = vld [vmem:[%s3629_s1 + $0x80] sm:$0xff]  ;;  %v2765_v36 = vld [vmem:[%s3633_s5 + $0x88] sm:$0xff]  ;;  %s2052_s20 = sshll.u32 %s2561_s9, 4 }
  0x1b   : > { %v310_v4 = vld [vmem:[%s309_s25] sm:$0xf]  ;;  %v328_v37 = vld [vmem:[%s3629_s1 + $0x88] sm:$0xff]  ;;  %v2777_v38 = vld [vmem:[%s3633_s5 + $0x90] sm:$0xff]  ;;  %s299_s21 = scalar_lea.vmem [#allocation2], %s3544_s19  ;;  %s3553_s25 = scalar_lea.hbm %s3635_s7, %s2052_s20 }
  0x1c   : > { %2124 = vmatprep.subr.msk.mxu0 %vm632_vm1, %v310_v4  ;;  %v329_v39 = vld [vmem:[%s3629_s1 + $0x90] sm:$0xff]  ;;  %v2785_v40 = vld [vmem:[%s3633_s5 + $0x98] sm:$0xff]  ;;  %v2797_v42 = vld [vmem:[%s3633_s5 + $0xa0] sm:$0xff]  ;;  %s1917_s22 = sshll.u32 %s299_s21, 4  ;;  %s1901_s26 = scalar_lea.sflag [#allocation3], %s3544_s19  ;;  %s3555_s22 = int_to_ptr.vmem [resolvable:$true] %s1917_s22 }
  0x1d   : > { %2125 = vmatpush3.msk.msra.mxu0 %vm632_vm1, %v310_v4  ;;  %407 = vperm.xlu0 %2350, %v2657_v14   ;;  %v330_v41 = vld [vmem:[%s3629_s1 + $0x98] sm:$0xff]  ;;  %v331_v43 = vld [vmem:[%s3629_s1 + $0xa0] sm:$0xff]  ;;  %v2805_v44 = vld [vmem:[%s3633_s5 + $0xa8] sm:$0xff]  ;;  %s2393_s10 = scalar_lea.vmem %s3555_s22, 16  ;;  %p2400_p0 = scmp.lt.s32.totalorder %s3555_s22, %s2398_s13 }
  0x1e   : > { %2127 = vmatmul.mubr.msk.f32.vlgmr.msra.gmra.mrb[0].mxu0 %vm535_vm0, %v312_v5  ;;  %412 = vperm.xlu1 %2351, %v2665_v16   ;;  %v332_v45 = vld [vmem:[%s3629_s1 + $0xa8] sm:$0xff]  ;;  %v2817_v46 = vld [vmem:[%s3633_s5 + $0xb0] sm:$0xff]  ;;  %v2825_v48 = vld [vmem:[%s3633_s5 + $0xb8] sm:$0xff]  ;;  %v2490_v5 = vmov 0.0|0.0   ;;  %p2394_p11 = scmp.ne.s32.totalorder %s3555_s22, %s2393_s10  ;;  %p2401_p1 = scmp.lt.s32.totalorder %s2399_s17, %s2393_s10 }
  0x1f   : > { %2129 = vmatprep.mubr.msk.f32.mxu0 %vm535_vm0, %v313_v7  ;;  %v333_v47 = vld [vmem:[%s3629_s1 + $0xb0] sm:$0xff]  ;;  %v334_v49 = vld [vmem:[%s3629_s1 + $0xb8] sm:$0xff]  ;;  %v2837_v50 = vld [vmem:[%s3633_s5 + $0xc0] sm:$0xff]  ;;  %2174 = vmatprep.subr.bf16.mxu1 %v2490_v5 }
  0x20   : > { %v335_v51 = vld [vmem:[%s3629_s1 + $0xc0] sm:$0xff]  ;;  %v2845_v52 = vld [vmem:[%s3633_s5 + $0xc8] sm:$0xff]  ;;  %v2857_v54 = vld [vmem:[%s3633_s5 + $0xd0] sm:$0xff]  ;;  %2222 = vmatprep.subr.bf16.mxu0 %v2490_v5  ;;  %p2395_p12 = pnand %p2394_p11, %p2578_p5  ;;  %p2402_p2 = por %p2401_p1, %p2400_p0 }
  0x21   : > { %417 = vperm.xlu0 %2350, %v2677_v18   ;;  %v336_v53 = vld [vmem:[%s3629_s1 + $0xc8] sm:$0xff]  ;;  %v337_v55 = vld [vmem:[%s3629_s1 + $0xd0] sm:$0xff]  ;;  %v2865_v56 = vld [vmem:[%s3633_s5 + $0xd8] sm:$0xff] }
  0x22   : > { %2130 = vmatmul.mubr.msk.f32.gmra.mrb[2].mxu0 %vm535_vm0, %v314_v9  ;;  %422 = vperm.xlu1 %2351, %v2685_v20   ;;  %v338_v57 = vld [vmem:[%s3629_s1 + $0xd8] sm:$0xff]  ;;  %v2877_v58 = vld [vmem:[%s3633_s5 + $0xe0] sm:$0xff]  ;;  %v2885_v60 = vld [vmem:[%s3633_s5 + $0xe8] sm:$0xff]  ;;  %p2396_p13 = pneg %p2395_p12 }
  0x23   : > { %2132 = vmatprep.mubr.msk.f32.mxu0 %vm535_vm0, %v315_v11  ;;  %v339_v59 = vld [vmem:[%s3629_s1 + $0xe0] sm:$0xff]  ;;  %v340_v61 = vld [vmem:[%s3629_s1 + $0xe8] sm:$0xff]  ;;  %v2897_v62 = vld [vmem:[%s3633_s5 + $0xf0] sm:$0xff] }
  0x24   : > { %v341_v63 = vld [vmem:[%s3629_s1 + $0xf0] sm:$0xff]  ;;  %v2905_v0 = vld [vmem:[%s3633_s5 + $0xf8] sm:$0xff]  ;;  %v894_v7 = vld [vmem:[%s3630_s2 + $0x8] sm:$0xff]  ;;  %p2403_p3 = pnand %p2402_p2, %p2396_p13 }
  0x25   : > { %427 = vperm.xlu0 %2350, %v2697_v22   ;;  %v342_v4 = vld [vmem:[%s3629_s1 + $0xf8] sm:$0xff]  ;;  %1149 = vmatprep.mubr.f32.mxu1 %v894_v7 }
  0x26   : > { %2133 = vmatmul.mubr.msk.f32.gmra.mrb[4].mxu0 %vm535_vm0, %v316_v13  ;;  %432 = vperm.xlu1 %2351, %v2705_v24  }
  0x27   : > { %2135 = vmatprep.mubr.msk.f32.mxu0 %vm535_vm0, %v317_v15 }
  0x29   : > { %437 = vperm.xlu0 %2350, %v2717_v26  }
  0x2a   : > { %2136 = vmatmul.mubr.msk.f32.gmra.mrb[6].mxu0 %vm535_vm0, %v318_v17  ;;  %442 = vperm.xlu1 %2351, %v2725_v28  }
  0x2b   : > { %2138 = vmatprep.mubr.msk.f32.mxu0 %vm535_vm0, %v319_v19 }
  0x2d   : > { %447 = vperm.xlu0 %2350, %v2737_v30  }
  0x2e   : > { %2139 = vmatmul.mubr.msk.f32.gmra.mrb[8].mxu0 %vm535_vm0, %v320_v21  ;;  %452 = vperm.xlu1 %2351, %v2745_v32  }
  0x2f   : > { %2141 = vmatprep.mubr.msk.f32.mxu0 %vm535_vm0, %v321_v23 }
  0x31   : > { %457 = vperm.xlu0 %2350, %v2757_v34  }
  0x32   : > { %2142 = vmatmul.mubr.msk.f32.gmra.mrb[10].mxu0 %vm535_vm0, %v322_v25  ;;  %462 = vperm.xlu1 %2351, %v2765_v36  }
  0x33   : > { %2144 = vmatprep.mubr.msk.f32.mxu0 %vm535_vm0, %v323_v27 }
  0x35   : > { %467 = vperm.xlu0 %2350, %v2777_v38  }
  0x36   : > { %2145 = vmatmul.mubr.msk.f32.gmra.mrb[12].mxu0 %vm535_vm0, %v324_v29  ;;  %472 = vperm.xlu1 %2351, %v2785_v40  }
  0x37   : > { %2147 = vmatprep.mubr.msk.f32.mxu0 %vm535_vm0, %v325_v31 }
  0x39   : > { %477 = vperm.xlu0 %2350, %v2797_v42  }
  0x3a   : > { %2148 = vmatmul.mubr.msk.f32.gmra.mrb[14].mxu0 %vm535_vm0, %v326_v33  ;;  %482 = vperm.xlu1 %2351, %v2805_v44  }
  0x3b   : > { %2150 = vmatprep.mubr.msk.f32.mxu0 %vm535_vm0, %v327_v35 }
  0x3d   : > { %487 = vperm.xlu0 %2350, %v2817_v46  }
  0x3e   : > { %2151 = vmatmul.mubr.msk.f32.gmra.mrb[16].mxu0 %vm535_vm0, %v328_v37  ;;  %492 = vperm.xlu1 %2351, %v2825_v48  }
  0x3f   : > { %2153 = vmatprep.mubr.msk.f32.mxu0 %vm535_vm0, %v329_v39 }
  0x41   : > { %497 = vperm.xlu0 %2350, %v2837_v50  }
  0x42   : > { %2154 = vmatmul.mubr.msk.f32.gmra.mrb[18].mxu0 %vm535_vm0, %v330_v41  ;;  %502 = vperm.xlu1 %2351, %v2845_v52  }
  0x43   : > { %2156 = vmatprep.mubr.msk.f32.mxu0 %vm535_vm0, %v331_v43 }
  0x45   : > { %507 = vperm.xlu0 %2350, %v2857_v54  }
  0x46   : > { %2157 = vmatmul.mubr.msk.f32.gmra.mrb[20].mxu0 %vm535_vm0, %v332_v45  ;;  %512 = vperm.xlu1 %2351, %v2865_v56  }
  0x47   : > { %2159 = vmatprep.mubr.msk.f32.mxu0 %vm535_vm0, %v333_v47 }
  0x49   : > { %517 = vperm.xlu0 %2350, %v2877_v58  }
  0x4a   : > { %2160 = vmatmul.mubr.msk.f32.gmra.mrb[22].mxu0 %vm535_vm0, %v334_v49  ;;  %522 = vperm.xlu1 %2351, %v2885_v60  }
  0x4b   : > { %2162 = vmatprep.mubr.msk.f32.mxu0 %vm535_vm0, %v335_v51 }
  0x4d   : > { %527 = vperm.xlu0 %2350, %v2897_v62  }
  0x4e   : > { %2163 = vmatmul.mubr.msk.f32.gmra.mrb[24].mxu0 %vm535_vm0, %v336_v53  ;;  %532 = vperm.xlu1 %2351, %v2905_v0  }
  0x4f   : > { %2165 = vmatprep.mubr.msk.f32.mxu0 %vm535_vm0, %v337_v55 }
  0x52   : > { %2166 = vmatmul.mubr.msk.f32.gmra.mrb[26].mxu0 %vm535_vm0, %v338_v57 }
  0x53   : > { %2168 = vmatprep.mubr.msk.f32.mxu0 %vm535_vm0, %v339_v59 }
  0x56   : > { %2169 = vmatmul.mubr.msk.f32.gmra.mrb[28].mxu0 %vm535_vm0, %v340_v61 }
  0x57   : > { %2171 = vmatprep.mubr.msk.f32.mxu0 %vm535_vm0, %v341_v63 }
  0x5a   : > { %2172 = vmatmul.mubr.msk.f32.gmra.mrb[30].mxu0 %vm535_vm0, %v342_v4 }
  0x90   : > { %v378_v11 = vpop.permute.xlu0 %377 }
  0x91   : > { %v388_v9 = vpop.permute.xlu1 %387 }
  0x94   : > { %v383_v15 = vpop.permute.xlu0 %382 }
  0x95   : > { %v393_v13 = vpop.permute.xlu1 %392 }
  0x98   : > { %v398_v19 = vpop.permute.xlu0 %397 }
  0x99   : > { %v403_v17 = vpop.permute.xlu1 %402 }
  0x9c   : > { %v408_v23 = vpop.permute.xlu0 %407 }
  0x9d   : > { %v413_v21 = vpop.permute.xlu1 %412 }
  0xa0   : > { %v418_v27 = vpop.permute.xlu0 %417 }
  0xa1   : > { %v423_v25 = vpop.permute.xlu1 %422 }
  0xa4   : > { %v428_v33 = vpop.permute.xlu0 %427 }
  0xa5   : > { %v433_v29 = vpop.permute.xlu1 %432 }
  0xa8   : > { %v438_v57 = vpop.permute.xlu0 %437 }
  0xa9   : > { %v443_v51 = vpop.permute.xlu1 %442 }
  0xf1   : > { %v2128_v31 = vpop.f32.mrb[0].mxu0 }
  0xf2   : > { %v708_v35 = vadd.f32 %v2128_v31, %v383_v15  ;;  %v702_v37 = vpop.f32.mrb[1].mxu0 }
  0xf3   : > { %v703_v39 = vadd.f32 %v702_v37, %v378_v11 }
  0xf4   : > { %v862_v41 = vmax.f32 %v708_v35, 0.0  ;;  %v453_v35 = vpop.permute.xlu1 %452 }
  0xf5   : > { %v861_v43 = vmax.f32 %v703_v39, 0.0  ;;  %v2131_v45 = vpop.f32.mrb[2].mxu0 }
  0xf6   : > { %v718_v47 = vadd.f32 %v2131_v45, %v393_v13  ;;  %v712_v49 = vpop.f32.mrb[3].mxu0  ;;  %v448_v13 = vpop.permute.xlu0 %447 }
  0xf7   : > { %v713_v53 = vadd.f32 %v712_v49, %v388_v9  ;;  %v2175_v55 = vpack.c.bf16 %v862_v41, %v861_v43 }
  0xf8   : > { %v864_v59 = vmax.f32 %v718_v47, 0.0 }
  0xf9   : > { %v863_v61 = vmax.f32 %v713_v53, 0.0  ;;  %v2134_v63 = vpop.f32.mrb[4].mxu0  ;;  %2176 = vmatpush1.bf16.msra.mxu1 %v2175_v55 }
  0xfa   : > { %v728_v4 = vadd.f32 %v2134_v63, %v403_v17  ;;  %v722_v7 = vpop.f32.mrb[5].mxu0  ;;  %2177 = vmatprep.subr.bf16.mxu1 %v2490_v5  ;;  %v458_v63 = vpop.permute.xlu0 %457 }
  0xfb   : > { %v2178_v15 = vpack.c.bf16 %v864_v59, %v863_v61  ;;  %v723_v31 = vadd.f32 %v722_v7, %v398_v19  ;;  %v463_v19 = vpop.permute.xlu1 %462 }
  0xfc   : > { %v866_v11 = vmax.f32 %v728_v4, 0.0 }
  0xfd   : > { %v865_v37 = vmax.f32 %v723_v31, 0.0  ;;  %v2137_v39 = vpop.f32.mrb[6].mxu0  ;;  %2179 = vmatpush1.bf16.msra.mxu1 %v2178_v15 }
  0xfe   : > { %v738_v45 = vadd.f32 %v2137_v39, %v413_v21  ;;  %v732_v9 = vpop.f32.mrb[7].mxu0  ;;  %2180 = vmatprep.subr.bf16.mxu1 %v2490_v5 }
  0xff   : > { %v2181_v41 = vpack.c.bf16 %v866_v11, %v865_v37  ;;  %v733_v43 = vadd.f32 %v732_v9, %v408_v23  ;;  %v473_v39 = vpop.permute.xlu1 %472  ;;  %v2491_v9 = vmov 1  }
 0x100   : > { %v868_v47 = vmax.f32 %v738_v45, 0.0  ;;  %2352 = vset.pattern.permute.xlu0 %v2491_v9  ;;  %2353 = vset.pattern.permute.xlu1 %v2491_v9 }
 0x101   : > { %v867_v49 = vmax.f32 %v733_v43, 0.0  ;;  %v2140_v17 = vpop.f32.mrb[8].mxu0  ;;  %2182 = vmatpush1.bf16.msra.mxu1 %v2181_v41  ;;  %v468_v41 = vpop.permute.xlu0 %467  ;;  %958 = vperm.xlu0 %2352, %v2599_v2  }
 0x102   : > { %v748_v53 = vadd.f32 %v2140_v17, %v423_v25  ;;  %v742_v55 = vpop.f32.mrb[9].mxu0  ;;  %2183 = vmatprep.subr.bf16.mxu1 %v2490_v5  ;;  %962 = vperm.xlu1 %2353, %v2617_v6  }
 0x103   : > { %v2184_v59 = vpack.c.bf16 %v868_v47, %v867_v49  ;;  %v743_v61 = vadd.f32 %v742_v55, %v418_v27 }
 0x104   : > { %v870_v4 = vmax.f32 %v748_v53, 0.0 }
 0x105   : > { %v869_v7 = vmax.f32 %v743_v61, 0.0  ;;  %v2143_v21 = vpop.f32.mrb[10].mxu0  ;;  %2185 = vmatpush1.bf16.msra.mxu1 %v2184_v59  ;;  %970 = vperm.xlu0 %2352, %v2625_v8  }
 0x106   : > { %v758_v15 = vadd.f32 %v2143_v21, %v433_v29  ;;  %v752_v31 = vpop.f32.mrb[11].mxu0  ;;  %2186 = vmatprep.subr.bf16.mxu1 %v2490_v5  ;;  %966 = vperm.xlu1 %2353, %v2608_v3  }
 0x107   : > { %v2187_v23 = vpack.c.bf16 %v870_v4, %v869_v7  ;;  %v753_v11 = vadd.f32 %v752_v31, %v428_v33  ;;  %v478_v4 = vpop.permute.xlu0 %477 }
 0x108   : > { %v872_v37 = vmax.f32 %v758_v15, 0.0 }
 0x109   : > { %v871_v25 = vmax.f32 %v753_v11, 0.0  ;;  %v2146_v45 = vpop.f32.mrb[12].mxu0  ;;  %2188 = vmatpush1.bf16.msra.mxu1 %v2187_v23  ;;  %978 = vperm.xlu0 %2352, %v2645_v12  }
 0x10a   : > { %v768_v27 = vadd.f32 %v2146_v45, %v443_v51  ;;  %v762_v43 = vpop.f32.mrb[13].mxu0  ;;  %2189 = vmatprep.subr.bf16.mxu1 %v2490_v5  ;;  %v483_v51 = vpop.permute.xlu1 %482  ;;  %974 = vperm.xlu1 %2353, %v2637_v10  }
 0x10b   : > { %v2190_v29 = vpack.c.bf16 %v872_v37, %v871_v25  ;;  %v763_v47 = vadd.f32 %v762_v43, %v438_v57  ;;  %v488_v11 = vpop.permute.xlu0 %487 }
 0x10c   : > { %v874_v49 = vmax.f32 %v768_v27, 0.0 }
 0x10d   : > { %v873_v33 = vmax.f32 %v763_v47, 0.0  ;;  %v2149_v17 = vpop.f32.mrb[14].mxu0  ;;  %2191 = vmatpush1.bf16.msra.mxu1 %v2190_v29  ;;  %986 = vperm.xlu0 %2352, %v2665_v16  }
 0x10e   : > { %v778_v53 = vadd.f32 %v2149_v17, %v453_v35  ;;  %v772_v55 = vpop.f32.mrb[15].mxu0  ;;  %2192 = vmatprep.subr.bf16.mxu1 %v2490_v5  ;;  %v493_v8 = vpop.permute.xlu1 %492  ;;  %982 = vperm.xlu1 %2353, %v2657_v14  }
 0x10f   : > { %v2193_v59 = vpack.c.bf16 %v874_v49, %v873_v33  ;;  %v773_v61 = vadd.f32 %v772_v55, %v448_v13  ;;  %v498_v29 = vpop.permute.xlu0 %497 }
 0x110   : > { %v876_v2 = vmax.f32 %v778_v53, 0.0 }
 0x111   : > { %v875_v57 = vmax.f32 %v773_v61, 0.0  ;;  %v2152_v7 = vpop.f32.mrb[16].mxu0  ;;  %2194 = vmatpush1.bf16.msra.mxu1 %v2193_v59  ;;  %994 = vperm.xlu0 %2352, %v2685_v20  }
 0x112   : > { %v788_v6 = vadd.f32 %v2152_v7, %v463_v19  ;;  %v782_v21 = vpop.f32.mrb[17].mxu0  ;;  %2195 = vmatprep.subr.bf16.mxu1 %v2490_v5  ;;  %990 = vperm.xlu1 %2353, %v2677_v18  }
 0x113   : > { %v2196_v35 = vpack.c.bf16 %v876_v2, %v875_v57  ;;  %v783_v15 = vadd.f32 %v782_v21, %v458_v63  ;;  %v508_v59 = vpop.permute.xlu0 %507 }
 0x114   : > { %v878_v31 = vmax.f32 %v788_v6, 0.0 }
 0x115   : > { %v877_v13 = vmax.f32 %v783_v15, 0.0  ;;  %v2155_v23 = vpop.f32.mrb[18].mxu0  ;;  %2197 = vmatpush1.bf16.msra.mxu1 %v2196_v35  ;;  %1002 = vperm.xlu0 %2352, %v2705_v24  }
 0x116   : > { %v798_v3 = vadd.f32 %v2155_v23, %v473_v39  ;;  %v792_v37 = vpop.f32.mrb[19].mxu0  ;;  %2198 = vmatprep.subr.bf16.mxu1 %v2490_v5  ;;  %v503_v39 = vpop.permute.xlu1 %502  ;;  %998 = vperm.xlu1 %2353, %v2697_v22  }
 0x117   : > { %v2199_v19 = vpack.c.bf16 %v878_v31, %v877_v13  ;;  %v793_v25 = vadd.f32 %v792_v37, %v468_v41  ;;  %v518_v31 = vpop.permute.xlu0 %517 }
 0x118   : > { %v880_v45 = vmax.f32 %v798_v3, 0.0 }
 0x119   : > { %v879_v12 = vmax.f32 %v793_v25, 0.0  ;;  %v2158_v63 = vpop.f32.mrb[20].mxu0  ;;  %2200 = vmatpush1.bf16.msra.mxu1 %v2199_v19  ;;  %1010 = vperm.xlu0 %2352, %v2725_v28  }
 0x11a   : > { %v808_v10 = vadd.f32 %v2158_v63, %v483_v51  ;;  %v802_v9 = vpop.f32.mrb[21].mxu0  ;;  %2201 = vmatprep.subr.bf16.mxu1 %v2490_v5  ;;  %v513_v20 = vpop.permute.xlu1 %512  ;;  %1006 = vperm.xlu1 %2353, %v2717_v26  }
 0x11b   : > { %v2202_v27 = vpack.c.bf16 %v880_v45, %v879_v12  ;;  %v803_v43 = vadd.f32 %v802_v9, %v478_v4  ;;  %v528_v45 = vpop.permute.xlu0 %527 }
 0x11c   : > { %v882_v47 = vmax.f32 %v808_v10, 0.0 }
 0x11d   : > { %v881_v16 = vmax.f32 %v803_v43, 0.0  ;;  %v2161_v41 = vpop.f32.mrb[22].mxu0  ;;  %2203 = vmatpush1.bf16.msra.mxu1 %v2202_v27  ;;  %1018 = vperm.xlu0 %2352, %v2745_v32   ;;  %v910_v27 = vld [vmem:[%s3630_s2 + $0x88] sm:$0xff]  ;;  %v909_v43 = vld [vmem:[%s3630_s2 + $0x80] sm:$0xff] }
 0x11e   : > { %v818_v14 = vadd.f32 %v2161_v41, %v493_v8  ;;  %v812_v49 = vpop.f32.mrb[23].mxu0  ;;  %2204 = vmatprep.subr.bf16.mxu1 %v2490_v5  ;;  %v523_v21 = vpop.permute.xlu1 %522  ;;  %1014 = vperm.xlu1 %2353, %v2737_v30   ;;  %v913_v41 = vld [vmem:[%s3630_s2 + $0xa0] sm:$0xff] }
 0x11f   : > { %v2205_v33 = vpack.c.bf16 %v882_v47, %v881_v16  ;;  %v813_v17 = vadd.f32 %v812_v49, %v488_v11  ;;  %v911_v47 = vld [vmem:[%s3630_s2 + $0x90] sm:$0xff]  ;;  %v914_v16 = vld [vmem:[%s3630_s2 + $0xa8] sm:$0xff] }
 0x120   : > { %v884_v53 = vmax.f32 %v818_v14, 0.0  ;;  %v916_v14 = vld [vmem:[%s3630_s2 + $0xb8] sm:$0xff]  ;;  %v915_v49 = vld [vmem:[%s3630_s2 + $0xb0] sm:$0xff] }
 0x121   : > { %v883_v55 = vmax.f32 %v813_v17, 0.0  ;;  %v2164_v51 = vpop.f32.mrb[24].mxu0  ;;  %2206 = vmatpush1.bf16.msra.mxu1 %v2205_v33  ;;  %1026 = vperm.xlu0 %2352, %v2765_v36   ;;  %v918_v33 = vld [vmem:[%s3630_s2 + $0xc8] sm:$0xff]  ;;  %v917_v17 = vld [vmem:[%s3630_s2 + $0xc0] sm:$0xff] }
 0x122   : > { %v828_v18 = vadd.f32 %v2164_v51, %v503_v39  ;;  %v822_v61 = vpop.f32.mrb[25].mxu0  ;;  %2207 = vmatprep.subr.bf16.mxu1 %v2490_v5  ;;  %1022 = vperm.xlu1 %2353, %v2757_v34   ;;  %v533_v32 = vpop.permute.xlu1 %532  ;;  %v893_v39 = vld [vmem:[%s3630_s2] sm:$0xff] }
 0x123   : > { %v2208_v4 = vpack.c.bf16 %v884_v53, %v883_v55  ;;  %v823_v2 = vadd.f32 %v822_v61, %v498_v29  ;;  %v912_v29 = vld [vmem:[%s3630_s2 + $0x98] sm:$0xff]  ;;  %v922_v55 = vld [vmem:[%s3630_s2 + $0xe8] sm:$0xff]  ;;  %v921_v51 = vld [vmem:[%s3630_s2 + $0xe0] sm:$0xff] }
 0x124   : > { %v886_v57 = vmax.f32 %v828_v18, 0.0  ;;  %v920_v53 = vld [vmem:[%s3630_s2 + $0xd8] sm:$0xff]  ;;  %v923_v18 = vld [vmem:[%s3630_s2 + $0xf0] sm:$0xff]  ;;  %v926_v61 = vld [vmem:[%s3630_s2 + $0x108] sm:$0xff] }
 0x125   : > { %v885_v24 = vmax.f32 %v823_v2, 0.0  ;;  %v2167_v7 = vpop.f32.mrb[26].mxu0  ;;  %2209 = vmatpush1.bf16.msra.mxu1 %v2208_v4  ;;  %1034 = vperm.xlu0 %2352, %v2785_v40   ;;  %v896_v40 = vld [vmem:[%s3630_s2 + $0x18] sm:$0xff]  ;;  %v925_v4 = vld [vmem:[%s3630_s2 + $0x100] sm:$0xff] }
 0x126   : > { %v838_v22 = vadd.f32 %v2167_v7, %v513_v20  ;;  %v832_v6 = vpop.f32.mrb[27].mxu0  ;;  %2210 = vmatprep.subr.bf16.mxu1 %v2490_v5  ;;  %1030 = vperm.xlu1 %2353, %v2777_v38   ;;  %v895_v38 = vld [vmem:[%s3630_s2 + $0x10] sm:$0xff]  ;;  %v928_v2 = vld [vmem:[%s3630_s2 + $0x118] sm:$0xff]  ;;  %v929_v7 = vld [vmem:[%s3630_s2 + $0x120] sm:$0xff] }
 0x127   : > { %v2211_v35 = vpack.c.bf16 %v886_v57, %v885_v24  ;;  %v833_v15 = vadd.f32 %v832_v6, %v508_v59  ;;  %v919_v20 = vld [vmem:[%s3630_s2 + $0xd0] sm:$0xff]  ;;  %v924_v59 = vld [vmem:[%s3630_s2 + $0xf8] sm:$0xff]  ;;  %v930_v24 = vld [vmem:[%s3630_s2 + $0x128] sm:$0xff] }
 0x128   : > { %v888_v8 = vmax.f32 %v838_v22, 0.0  ;;  %v927_v57 = vld [vmem:[%s3630_s2 + $0x110] sm:$0xff]  ;;  %v932_v22 = vld [vmem:[%s3630_s2 + $0x138] sm:$0xff] }
 0x129   : > { %v887_v28 = vmax.f32 %v833_v15, 0.0  ;;  %v2170_v13 = vpop.f32.mrb[28].mxu0  ;;  %2212 = vmatpush1.bf16.msra.mxu1 %v2211_v35  ;;  %1042 = vperm.xlu0 %2352, %v2805_v44   ;;  %v897_v44 = vld [vmem:[%s3630_s2 + $0x20] sm:$0xff]  ;;  %v931_v6 = vld [vmem:[%s3630_s2 + $0x130] sm:$0xff]  ;;  %v936_v15 = vld [vmem:[%s3630_s2 + $0x158] sm:$0xff] }
 0x12a   : > { %v848_v26 = vadd.f32 %v2170_v13, %v523_v21  ;;  %v842_v23 = vpop.f32.mrb[29].mxu0  ;;  %2213 = vmatprep.subr.bf16.mxu1 %v2490_v5  ;;  %1038 = vperm.xlu1 %2353, %v2797_v42   ;;  %v898_v42 = vld [vmem:[%s3630_s2 + $0x28] sm:$0xff]  ;;  %v933_v35 = vld [vmem:[%s3630_s2 + $0x140] sm:$0xff]  ;;  %v940_v13 = vld [vmem:[%s3630_s2 + $0x178] sm:$0xff] }
 0x12b   : > { %v2214_v11 = vpack.c.bf16 %v888_v8, %v887_v28  ;;  %v843_v3 = vadd.f32 %v842_v23, %v518_v31  ;;  %v934_v21 = vld [vmem:[%s3630_s2 + $0x148] sm:$0xff]  ;;  %v935_v31 = vld [vmem:[%s3630_s2 + $0x150] sm:$0xff]  ;;  %v937_v28 = vld [vmem:[%s3630_s2 + $0x160] sm:$0xff] }
 0x12c   : > { %v890_v37 = vmax.f32 %v848_v26, 0.0  ;;  %v938_v8 = vld [vmem:[%s3630_s2 + $0x168] sm:$0xff]  ;;  %v939_v26 = vld [vmem:[%s3630_s2 + $0x170] sm:$0xff] }
 0x12d   : > { %v889_v19 = vmax.f32 %v843_v3, 0.0  ;;  %v2173_v25 = vpop.f32.mrb[30].mxu0  ;;  %2215 = vmatpush1.bf16.msra.mxu1 %v2214_v11  ;;  %1050 = vperm.xlu0 %2352, %v2825_v48   ;;  %v899_v48 = vld [vmem:[%s3630_s2 + $0x30] sm:$0xff]  ;;  %v942_v23 = vld [vmem:[%s3630_s2 + $0x188] sm:$0xff]  ;;  %v941_v11 = vld [vmem:[%s3630_s2 + $0x180] sm:$0xff] }
 0x12e   : > { %v858_v30 = vadd.f32 %v2173_v25, %v533_v32  ;;  %v852_v12 = vpop.f32.mrb[31].mxu0  ;;  %2216 = vmatprep.subr.bf16.mxu1 %v2490_v5  ;;  %1046 = vperm.xlu1 %2353, %v2817_v46   ;;  %v900_v46 = vld [vmem:[%s3630_s2 + $0x38] sm:$0xff]  ;;  %v946_v32 = vld [vmem:[%s3630_s2 + $0x1a8] sm:$0xff] }
 0x12f   : > { %v2217_v63 = vpack.c.bf16 %v890_v37, %v889_v19  ;;  %v853_v10 = vadd.f32 %v852_v12, %v528_v45  ;;  %v944_v3 = vld [vmem:[%s3630_s2 + $0x198] sm:$0xff]  ;;  %v943_v37 = vld [vmem:[%s3630_s2 + $0x190] sm:$0xff]  ;;  %v945_v19 = vld [vmem:[%s3630_s2 + $0x1a0] sm:$0xff] }
 0x130   : > { %v892_v9 = vmax.f32 %v858_v30, 0.0  ;;  %v948_v25 = vld [vmem:[%s3630_s2 + $0x1b8] sm:$0xff]  ;;  %v947_v45 = vld [vmem:[%s3630_s2 + $0x1b0] sm:$0xff]  ;;  %v950_v30 = vld [vmem:[%s3630_s2 + $0x1c8] sm:$0xff] }
 0x131   : > { %v891_v36 = vmax.f32 %v853_v10, 0.0  ;;  %2218 = vmatpush1.bf16.msra.mxu1 %v2217_v63  ;;  %1058 = vperm.xlu0 %2352, %v2845_v52   ;;  %v901_v52 = vld [vmem:[%s3630_s2 + $0x40] sm:$0xff]  ;;  %v952_v63 = vld [vmem:[%s3630_s2 + $0x1d8] sm:$0xff]  ;;  %v951_v10 = vld [vmem:[%s3630_s2 + $0x1d0] sm:$0xff] }
 0x132   : > { %2219 = vmatprep.subr.bf16.mxu1 %v2490_v5  ;;  %1054 = vperm.xlu1 %2353, %v2837_v50   ;;  %v902_v50 = vld [vmem:[%s3630_s2 + $0x48] sm:$0xff]  ;;  %v949_v12 = vld [vmem:[%s3630_s2 + $0x1c0] sm:$0xff] }
 0x133   : > { %v2220_v34 = vpack.c.bf16 %v892_v9, %v891_v36  ;;  %v954_v9 = vld [vmem:[%s3630_s2 + $0x1e8] sm:$0xff]  ;;  %v953_v36 = vld [vmem:[%s3630_s2 + $0x1e0] sm:$0xff] }
 0x135   : > { %2221 = vmatpush1.bf16.msra.mxu1 %v2220_v34  ;;  %1066 = vperm.xlu0 %2352, %v2865_v56   ;;  %v903_v56 = vld [vmem:[%s3630_s2 + $0x50] sm:$0xff]  ;;  %v956_v34 = vld [vmem:[%s3630_s2 + $0x1f8] sm:$0xff] }
 0x136   : > { %1062 = vperm.xlu1 %2353, %v2857_v54   ;;  %v904_v54 = vld [vmem:[%s3630_s2 + $0x58] sm:$0xff] }
 0x138   : > { %1150 = vmatmul.mubr.f32.vlgmr.msra.gmra.mrb[0].mxu1 %v893_v39  ;;  %v955_v39 = vld [vmem:[%s3630_s2 + $0x1f0] sm:$0xff] }
 0x139   : > { %1154 = vmatprep.mubr.f32.mxu1 %v896_v40  ;;  %1074 = vperm.xlu0 %2352, %v2885_v60   ;;  %v905_v60 = vld [vmem:[%s3630_s2 + $0x60] sm:$0xff] }
 0x13a   : > { %1070 = vperm.xlu1 %2353, %v2877_v58   ;;  %v906_v58 = vld [vmem:[%s3630_s2 + $0x68] sm:$0xff] }
 0x13c   : > { %1155 = vmatmul.mubr.f32.gmra.mrb[2].mxu1 %v895_v38 }
 0x13d   : > { %1159 = vmatprep.mubr.f32.mxu1 %v898_v42  ;;  %1082 = vperm.xlu0 %2352, %v2905_v0   ;;  %v908_v0 = vld [vmem:[%s3630_s2 + $0x78] sm:$0xff] }
 0x13e   : > { %1078 = vperm.xlu1 %2353, %v2897_v62   ;;  %v907_v62 = vld [vmem:[%s3630_s2 + $0x70] sm:$0xff] }
 0x140   : > { %1160 = vmatmul.mubr.f32.gmra.mrb[4].mxu1 %v897_v44 }
 0x141   : > { %1164 = vmatprep.mubr.f32.mxu1 %v900_v46 }
 0x144   : > { %1165 = vmatmul.mubr.f32.gmra.mrb[6].mxu1 %v899_v48  ;;  %v1343_v48 = vld [vmem:[%s3631_s3 + $0x8] sm:$0xff] }
 0x145   : > { %1169 = vmatprep.mubr.f32.mxu1 %v902_v50  ;;  %1598 = vmatprep.mubr.f32.mxu0 %v1343_v48 }
 0x148   : > { %1170 = vmatmul.mubr.f32.gmra.mrb[8].mxu1 %v901_v52 }
 0x149   : > { %1174 = vmatprep.mubr.f32.mxu1 %v904_v54 }
 0x14c   : > { %1175 = vmatmul.mubr.f32.gmra.mrb[10].mxu1 %v903_v56 }
 0x14d   : > { %1179 = vmatprep.mubr.f32.mxu1 %v906_v58 }
 0x150   : > { %1180 = vmatmul.mubr.f32.gmra.mrb[12].mxu1 %v905_v60 }
 0x151   : > { %1184 = vmatprep.mubr.f32.mxu1 %v908_v0 }
 0x154   : > { %1185 = vmatmul.mubr.f32.gmra.mrb[14].mxu1 %v907_v62 }
 0x155   : > { %1189 = vmatprep.mubr.f32.mxu1 %v910_v27 }
 0x158   : > { %1190 = vmatmul.mubr.f32.gmra.mrb[16].mxu1 %v909_v43 }
 0x159   : > { %1194 = vmatprep.mubr.f32.mxu1 %v912_v29 }
 0x15c   : > { %1195 = vmatmul.mubr.f32.gmra.mrb[18].mxu1 %v911_v47 }
 0x15d   : > { %1199 = vmatprep.mubr.f32.mxu1 %v914_v16 }
 0x160   : > { %1200 = vmatmul.mubr.f32.gmra.mrb[20].mxu1 %v913_v41 }
 0x161   : > { %1204 = vmatprep.mubr.f32.mxu1 %v916_v14 }
 0x164   : > { %1205 = vmatmul.mubr.f32.gmra.mrb[22].mxu1 %v915_v49 }
 0x165   : > { %1209 = vmatprep.mubr.f32.mxu1 %v918_v33 }
 0x168   : > { %1210 = vmatmul.mubr.f32.gmra.mrb[24].mxu1 %v917_v17 }
 0x169   : > { %1214 = vmatprep.mubr.f32.mxu1 %v920_v53 }
 0x16c   : > { %1215 = vmatmul.mubr.f32.gmra.mrb[26].mxu1 %v919_v20 }
 0x16d   : > { %1219 = vmatprep.mubr.f32.mxu1 %v922_v55 }
 0x170   : > { %1220 = vmatmul.mubr.f32.gmra.mrb[28].mxu1 %v921_v51 }
 0x171   : > { %1224 = vmatprep.mubr.f32.mxu1 %v924_v59 }
 0x174   : > { %1225 = vmatmul.mubr.f32.gmra.mrb[30].mxu1 %v923_v18 }
 0x175   : > { %1229 = vmatprep.mubr.f32.mxu1 %v926_v61 }
 0x178   : > { %1230 = vmatmul.mubr.f32.gmra.mrb[32].mxu1 %v925_v4 }
 0x179   : > { %1234 = vmatprep.mubr.f32.mxu1 %v928_v2 }
 0x17c   : > { %1235 = vmatmul.mubr.f32.gmra.mrb[34].mxu1 %v927_v57 }
 0x17d   : > { %1239 = vmatprep.mubr.f32.mxu1 %v930_v24 }
 0x180   : > { %1240 = vmatmul.mubr.f32.gmra.mrb[36].mxu1 %v929_v7  ;;  %v959_v40 = vpop.permute.xlu0 %958 }
 0x181   : > { %1244 = vmatprep.mubr.f32.mxu1 %v932_v22  ;;  %v963_v44 = vpop.permute.xlu1 %962 }
 0x184   : > { %1245 = vmatmul.mubr.f32.gmra.mrb[38].mxu1 %v931_v6  ;;  %v971_v29 = vpop.permute.xlu0 %970 }
 0x185   : > { %1249 = vmatprep.mubr.f32.mxu1 %v934_v21  ;;  %v967_v60 = vpop.permute.xlu1 %966 }
 0x188   : > { %1250 = vmatmul.mubr.f32.gmra.mrb[40].mxu1 %v933_v35  ;;  %v979_v51 = vpop.permute.xlu0 %978 }
 0x189   : > { %1254 = vmatprep.mubr.f32.mxu1 %v936_v15  ;;  %v975_v20 = vpop.permute.xlu1 %974 }
 0x18c   : > { %1255 = vmatmul.mubr.f32.gmra.mrb[42].mxu1 %v935_v31  ;;  %v987_v21 = vpop.permute.xlu0 %986 }
 0x18d   : > { %1259 = vmatprep.mubr.f32.mxu1 %v938_v8  ;;  %v983_v22 = vpop.permute.xlu1 %982 }
 0x190   : > { %1260 = vmatmul.mubr.f32.gmra.mrb[44].mxu1 %v937_v28 }
 0x191   : > { %1264 = vmatprep.mubr.f32.mxu1 %v940_v13 }
 0x194   : > { %1265 = vmatmul.mubr.f32.gmra.mrb[46].mxu1 %v939_v26 }
 0x195   : > { %1269 = vmatprep.mubr.f32.mxu1 %v942_v23 }
 0x198   : > { %1270 = vmatmul.mubr.f32.gmra.mrb[48].mxu1 %v941_v11  ;;  %v991_v11 = vpop.permute.xlu1 %990 }
 0x199   : > { %1274 = vmatprep.mubr.f32.mxu1 %v944_v3 }
 0x19c   : > { %1275 = vmatmul.mubr.f32.gmra.mrb[50].mxu1 %v943_v37  ;;  %v995_v37 = vpop.permute.xlu0 %994 }
 0x19d   : > { %1279 = vmatprep.mubr.f32.mxu1 %v946_v32 }
 0x1a0   : > { %1280 = vmatmul.mubr.f32.gmra.mrb[52].mxu1 %v945_v19 }
 0x1a1   : > { %1284 = vmatprep.mubr.f32.mxu1 %v948_v25 }
 0x1a4   : > { %1285 = vmatmul.mubr.f32.gmra.mrb[54].mxu1 %v947_v45 }
 0x1a5   : > { %1289 = vmatprep.mubr.f32.mxu1 %v950_v30 }
 0x1a8   : > { %1290 = vmatmul.mubr.f32.gmra.mrb[56].mxu1 %v949_v12 }
 0x1a9   : > { %1294 = vmatprep.mubr.f32.mxu1 %v952_v63 }
 0x1ac   : > { %1295 = vmatmul.mubr.f32.gmra.mrb[58].mxu1 %v951_v10 }
 0x1ad   : > { %1299 = vmatprep.mubr.f32.mxu1 %v954_v9  ;;  %v999_v9 = vpop.permute.xlu1 %998 }
 0x1b0   : > { %1300 = vmatmul.mubr.f32.gmra.mrb[60].mxu1 %v953_v36 }
 0x1b1   : > { %1304 = vmatprep.mubr.f32.mxu1 %v956_v34  ;;  %v1003_v34 = vpop.permute.xlu0 %1002 }
 0x1b4   : > { %1305 = vmatmul.mubr.f32.gmra.mrb[62].mxu1 %v955_v39 }
 0x20b   : > { %v1151_v38 = vpop.f32.mrb[0].mxu1 }
 0x20c   : > { %v1153_v42 = vpop.f32.mrb[1].mxu1  ;;  %v1152_v46 = vadd.f32 %v1151_v38, %v959_v40 }
 0x20e   : > { %v1310_v56 = vmax.f32 %v1152_v46, 0.0 }
 0x20f   : > { %v1156_v50 = vpop.f32.mrb[2].mxu1 }
 0x210   : > { %v1157_v52 = vadd.f32 %v1156_v50, %v963_v44  ;;  %v1158_v54 = vpop.f32.mrb[3].mxu1 }
 0x212   : > { %v1311_v58 = vmax.f32 %v1157_v52, 0.0  ;;  %v1007_v52 = vpop.permute.xlu1 %1006 }
 0x213   : > { %v1161_v0 = vpop.f32.mrb[4].mxu1 }
 0x214   : > { %v2223_v62 = vpack.c.bf16 %v1311_v58, %v1310_v56  ;;  %v1163_v27 = vpop.f32.mrb[5].mxu1  ;;  %v1162_v43 = vadd.f32 %v1161_v0, %v967_v60  ;;  %v1011_v56 = vpop.permute.xlu0 %1010 }
 0x216   : > { %2224 = vmatpush1.bf16.msra.mxu0 %v2223_v62  ;;  %v1312_v14 = vmax.f32 %v1162_v43, 0.0 }
 0x217   : > { %v1166_v47 = vpop.f32.mrb[6].mxu1  ;;  %2225 = vmatprep.subr.bf16.mxu0 %v2490_v5 }
 0x218   : > { %v1167_v16 = vadd.f32 %v1166_v47, %v971_v29  ;;  %v1168_v41 = vpop.f32.mrb[7].mxu1 }
 0x21a   : > { %v1313_v49 = vmax.f32 %v1167_v16, 0.0  ;;  %v1015_v16 = vpop.permute.xlu1 %1014 }
 0x21b   : > { %v1171_v33 = vpop.f32.mrb[8].mxu1 }
 0x21c   : > { %v2226_v17 = vpack.c.bf16 %v1313_v49, %v1312_v14  ;;  %v1173_v53 = vpop.f32.mrb[9].mxu1  ;;  %v1172_v55 = vadd.f32 %v1171_v33, %v975_v20  ;;  %v1019_v14 = vpop.permute.xlu0 %1018 }
 0x21e   : > { %2227 = vmatpush1.bf16.msra.mxu0 %v2226_v17  ;;  %v1314_v4 = vmax.f32 %v1172_v55, 0.0 }
 0x21f   : > { %v1176_v59 = vpop.f32.mrb[10].mxu1  ;;  %2228 = vmatprep.subr.bf16.mxu0 %v2490_v5 }
 0x220   : > { %v1177_v18 = vadd.f32 %v1176_v59, %v979_v51  ;;  %v1178_v61 = vpop.f32.mrb[11].mxu1 }
 0x222   : > { %v1315_v2 = vmax.f32 %v1177_v18, 0.0  ;;  %v1023_v18 = vpop.permute.xlu1 %1022 }
 0x223   : > { %v1181_v57 = vpop.f32.mrb[12].mxu1 }
 0x224   : > { %v2229_v24 = vpack.c.bf16 %v1315_v2, %v1314_v4  ;;  %v1183_v7 = vpop.f32.mrb[13].mxu1  ;;  %v1182_v6 = vadd.f32 %v1181_v57, %v983_v22  ;;  %v1027_v4 = vpop.permute.xlu0 %1026 }
 0x226   : > { %2230 = vmatpush1.bf16.msra.mxu0 %v2229_v24  ;;  %v1316_v8 = vmax.f32 %v1182_v6, 0.0 }
 0x227   : > { %v1186_v35 = vpop.f32.mrb[14].mxu1  ;;  %2231 = vmatprep.subr.bf16.mxu0 %v2490_v5 }
 0x228   : > { %v1187_v15 = vadd.f32 %v1186_v35, %v987_v21  ;;  %v1188_v31 = vpop.f32.mrb[15].mxu1 }
 0x22a   : > { %v1317_v28 = vmax.f32 %v1187_v15, 0.0  ;;  %v1031_v15 = vpop.permute.xlu1 %1030 }
 0x22b   : > { %v1191_v13 = vpop.f32.mrb[16].mxu1 }
 0x22c   : > { %v2232_v26 = vpack.c.bf16 %v1317_v28, %v1316_v8  ;;  %v1193_v23 = vpop.f32.mrb[17].mxu1  ;;  %v1192_v3 = vadd.f32 %v1191_v13, %v991_v11  ;;  %v1035_v8 = vpop.permute.xlu0 %1034 }
 0x22e   : > { %2233 = vmatpush1.bf16.msra.mxu0 %v2232_v26  ;;  %v1318_v45 = vmax.f32 %v1192_v3, 0.0 }
 0x22f   : > { %v1196_v32 = vpop.f32.mrb[18].mxu1  ;;  %2234 = vmatprep.subr.bf16.mxu0 %v2490_v5 }
 0x230   : > { %v1197_v19 = vadd.f32 %v1196_v32, %v995_v37  ;;  %v1198_v25 = vpop.f32.mrb[19].mxu1 }
 0x232   : > { %v1319_v30 = vmax.f32 %v1197_v19, 0.0  ;;  %v1039_v19 = vpop.permute.xlu1 %1038 }
 0x233   : > { %v1201_v12 = vpop.f32.mrb[20].mxu1 }
 0x234   : > { %v2235_v63 = vpack.c.bf16 %v1319_v30, %v1318_v45  ;;  %v1203_v10 = vpop.f32.mrb[21].mxu1  ;;  %v1202_v36 = vadd.f32 %v1201_v12, %v999_v9  ;;  %v2492_v45 = vmov 2   ;;  %v1043_v30 = vpop.permute.xlu0 %1042 }
 0x235   : > { %2354 = vset.pattern.permute.xlu1 %v2492_v45  ;;  %2355 = vset.pattern.permute.xlu0 %v2492_v45 }
 0x236   : > { %2236 = vmatpush1.bf16.msra.mxu0 %v2235_v63  ;;  %v1320_v42 = vmax.f32 %v1202_v36, 0.0  ;;  %v2361_v63 = vld [vmem:[%s3633_s5 + $0x80] sm:$0xff]  ;;  %v2362_v36 = vld [vmem:[%s3633_s5 + $0x88] sm:$0xff] }
 0x237   : > { %v1206_v39 = vpop.f32.mrb[22].mxu1  ;;  %2237 = vmatprep.subr.bf16.mxu0 %v2490_v5  ;;  %1471 = vperm.xlu1 %2354, %v2361_v63  }
 0x238   : > { %v1207_v40 = vadd.f32 %v1206_v39, %v1003_v34  ;;  %v1208_v38 = vpop.f32.mrb[23].mxu1  ;;  %1475 = vperm.xlu0 %2355, %v2362_v36  }
 0x239   : > { %v2363_v38 = vld [vmem:[%s3633_s5] sm:$0xff] }
 0x23a   : > { %v1321_v44 = vmax.f32 %v1207_v40, 0.0 }
 0x23b   : > { %v1211_v46 = vpop.f32.mrb[24].mxu1  ;;  %1407 = vperm.xlu1 %2354, %v2363_v38  }
 0x23c   : > { %v2238_v48 = vpack.c.bf16 %v1321_v44, %v1320_v42  ;;  %v1213_v50 = vpop.f32.mrb[25].mxu1  ;;  %v1212_v54 = vadd.f32 %v1211_v46, %v1007_v52  ;;  %v1047_v46 = vpop.permute.xlu1 %1046 }
 0x23d   : > { %v1051_v52 = vpop.permute.xlu0 %1050 }
 0x23e   : > { %2239 = vmatpush1.bf16.msra.mxu0 %v2238_v48  ;;  %v1322_v62 = vmax.f32 %v1212_v54, 0.0  ;;  %v2364_v48 = vld [vmem:[%s3633_s5 + $0x90] sm:$0xff] }
 0x23f   : > { %v1216_v58 = vpop.f32.mrb[26].mxu1  ;;  %2240 = vmatprep.subr.bf16.mxu0 %v2490_v5  ;;  %1479 = vperm.xlu0 %2355, %v2364_v48  }
 0x240   : > { %v1217_v60 = vadd.f32 %v1216_v58, %v1011_v56  ;;  %v1218_v0 = vpop.f32.mrb[27].mxu1  ;;  %v2365_v56 = vld [vmem:[%s3633_s5 + $0x8] sm:$0xff] }
 0x241   : > { %1411 = vperm.xlu1 %2354, %v2365_v56   ;;  %v2366_v0 = vld [vmem:[%s3633_s5 + $0x10] sm:$0xff] }
 0x242   : > { %v1323_v27 = vmax.f32 %v1217_v60, 0.0 }
 0x243   : > { %v1221_v43 = vpop.f32.mrb[28].mxu1  ;;  %1415 = vperm.xlu0 %2355, %v2366_v0  }
 0x244   : > { %v2241_v29 = vpack.c.bf16 %v1323_v27, %v1322_v62  ;;  %v1223_v47 = vpop.f32.mrb[29].mxu1  ;;  %v1222_v41 = vadd.f32 %v1221_v43, %v1015_v16 }
 0x246   : > { %2242 = vmatpush1.bf16.msra.mxu0 %v2241_v29  ;;  %v1324_v53 = vmax.f32 %v1222_v41, 0.0  ;;  %v2367_v29 = vld [vmem:[%s3633_s5 + $0x98] sm:$0xff]  ;;  %v1055_v41 = vpop.permute.xlu1 %1054 }
 0x247   : > { %v1226_v49 = vpop.f32.mrb[30].mxu1  ;;  %2243 = vmatprep.subr.bf16.mxu0 %v2490_v5  ;;  %1483 = vperm.xlu1 %2354, %v2367_v29   ;;  %v1345_v29 = vld [vmem:[%s3631_s3 + $0x18] sm:$0xff] }
 0x248   : > { %v1227_v33 = vadd.f32 %v1226_v49, %v1019_v14  ;;  %v1228_v17 = vpop.f32.mrb[31].mxu1  ;;  %v2368_v14 = vld [vmem:[%s3633_s5 + $0xa0] sm:$0xff] }
 0x249   : > { %1487 = vperm.xlu0 %2355, %v2368_v14   ;;  %v1347_v14 = vld [vmem:[%s3631_s3 + $0x28] sm:$0xff] }
 0x24a   : > { %v1325_v20 = vmax.f32 %v1227_v33, 0.0  ;;  %v1059_v33 = vpop.permute.xlu0 %1058 }
 0x24b   : > { %v1231_v55 = vpop.f32.mrb[32].mxu1 }
 0x24c   : > { %v2244_v51 = vpack.c.bf16 %v1325_v20, %v1324_v53  ;;  %v1233_v59 = vpop.f32.mrb[33].mxu1  ;;  %v1232_v61 = vadd.f32 %v1231_v55, %v1023_v18  ;;  %v2369_v53 = vld [vmem:[%s3633_s5 + $0x18] sm:$0xff] }
 0x24d   : > { %1419 = vperm.xlu1 %2354, %v2369_v53   ;;  %v1349_v53 = vld [vmem:[%s3631_s3 + $0x38] sm:$0xff] }
 0x24e   : > { %2245 = vmatpush1.bf16.msra.mxu0 %v2244_v51  ;;  %v1326_v7 = vmax.f32 %v1232_v61, 0.0  ;;  %v2370_v51 = vld [vmem:[%s3633_s5 + $0x20] sm:$0xff] }
 0x24f   : > { %v1236_v2 = vpop.f32.mrb[34].mxu1  ;;  %2246 = vmatprep.subr.bf16.mxu0 %v2490_v5  ;;  %1423 = vperm.xlu0 %2355, %v2370_v51   ;;  %v1348_v51 = vld [vmem:[%s3631_s3 + $0x30] sm:$0xff] }
 0x250   : > { %v1237_v57 = vadd.f32 %v1236_v2, %v1027_v4  ;;  %v1238_v24 = vpop.f32.mrb[35].mxu1  ;;  %v2371_v4 = vld [vmem:[%s3633_s5 + $0xa8] sm:$0xff] }
 0x251   : > { %1491 = vperm.xlu1 %2354, %v2371_v4   ;;  %v1063_v24 = vpop.permute.xlu1 %1062  ;;  %v1353_v4 = vld [vmem:[%s3631_s3 + $0x58] sm:$0xff] }
 0x252   : > { %v1327_v22 = vmax.f32 %v1237_v57, 0.0 }
 0x253   : > { %v1241_v6 = vpop.f32.mrb[36].mxu1 }
 0x254   : > { %v2247_v21 = vpack.c.bf16 %v1327_v22, %v1326_v7  ;;  %v1243_v35 = vpop.f32.mrb[37].mxu1  ;;  %v1242_v31 = vadd.f32 %v1241_v6, %v1031_v15  ;;  %v2372_v7 = vld [vmem:[%s3633_s5 + $0xb0] sm:$0xff]  ;;  %v1067_v6 = vpop.permute.xlu0 %1066 }
 0x255   : > { %1495 = vperm.xlu0 %2355, %v2372_v7   ;;  %v2373_v35 = vld [vmem:[%s3633_s5 + $0x28] sm:$0xff]  ;;  %v1357_v7 = vld [vmem:[%s3631_s3 + $0x78] sm:$0xff] }
 0x256   : > { %2248 = vmatpush1.bf16.msra.mxu0 %v2247_v21  ;;  %v1328_v23 = vmax.f32 %v1242_v31, 0.0  ;;  %1427 = vperm.xlu1 %2354, %v2373_v35   ;;  %v1361_v35 = vld [vmem:[%s3631_s3 + $0x98] sm:$0xff] }
 0x257   : > { %v1246_v28 = vpop.f32.mrb[38].mxu1  ;;  %2249 = vmatprep.subr.bf16.mxu0 %v2490_v5 }
 0x258   : > { %v1247_v13 = vadd.f32 %v1246_v28, %v1035_v8  ;;  %v1248_v26 = vpop.f32.mrb[39].mxu1  ;;  %v2374_v8 = vld [vmem:[%s3633_s5 + $0x30] sm:$0xff] }
 0x259   : > { %1431 = vperm.xlu0 %2355, %v2374_v8   ;;  %v1362_v8 = vld [vmem:[%s3631_s3 + $0xa0] sm:$0xff] }
 0x25a   : > { %v1329_v11 = vmax.f32 %v1247_v13, 0.0 }
 0x25b   : > { %v1251_v3 = vpop.f32.mrb[40].mxu1 }
 0x25c   : > { %v2250_v37 = vpack.c.bf16 %v1329_v11, %v1328_v23  ;;  %v1253_v32 = vpop.f32.mrb[41].mxu1  ;;  %v1252_v25 = vadd.f32 %v1251_v3, %v1039_v19  ;;  %v2375_v23 = vld [vmem:[%s3633_s5 + $0xb8] sm:$0xff] }
 0x25d   : > { %1499 = vperm.xlu1 %2354, %v2375_v23   ;;  %v2376_v32 = vld [vmem:[%s3633_s5 + $0xc0] sm:$0xff] }
 0x25e   : > { %2251 = vmatpush1.bf16.msra.mxu0 %v2250_v37  ;;  %v1330_v34 = vmax.f32 %v1252_v25, 0.0  ;;  %v1071_v37 = vpop.permute.xlu1 %1070  ;;  %1503 = vperm.xlu0 %2355, %v2376_v32   ;;  %v1075_v25 = vpop.permute.xlu0 %1074  ;;  %v1366_v23 = vld [vmem:[%s3631_s3 + $0xc0] sm:$0xff] }
 0x25f   : > { %v1256_v12 = vpop.f32.mrb[42].mxu1  ;;  %2252 = vmatprep.subr.bf16.mxu0 %v2490_v5  ;;  %v1370_v32 = vld [vmem:[%s3631_s3 + $0xe0] sm:$0xff] }
 0x260   : > { %v1257_v10 = vadd.f32 %v1256_v12, %v1043_v30  ;;  %v1258_v9 = vpop.f32.mrb[43].mxu1  ;;  %v2377_v30 = vld [vmem:[%s3633_s5 + $0x38] sm:$0xff] }
 0x261   : > { %1435 = vperm.xlu1 %2354, %v2377_v30   ;;  %v1374_v30 = vld [vmem:[%s3631_s3 + $0x100] sm:$0xff] }
 0x262   : > { %v1331_v39 = vmax.f32 %v1257_v10, 0.0  ;;  %v2378_v10 = vld [vmem:[%s3633_s5 + $0x40] sm:$0xff]  ;;  %v1083_v48 = vpop.permute.xlu0 %1082 }
 0x263   : > { %v1261_v40 = vpop.f32.mrb[44].mxu1  ;;  %1439 = vperm.xlu0 %2355, %v2378_v10   ;;  %v1379_v10 = vld [vmem:[%s3631_s3 + $0x128] sm:$0xff] }
 0x264   : > { %v2253_v42 = vpack.c.bf16 %v1331_v39, %v1330_v34  ;;  %v1263_v44 = vpop.f32.mrb[45].mxu1  ;;  %v1262_v50 = vadd.f32 %v1261_v40, %v1047_v46  ;;  %v2379_v39 = vld [vmem:[%s3633_s5 + $0xc8] sm:$0xff] }
 0x265   : > { %1507 = vperm.xlu1 %2354, %v2379_v39   ;;  %v2380_v44 = vld [vmem:[%s3633_s5 + $0xd0] sm:$0xff]  ;;  %v1383_v39 = vld [vmem:[%s3631_s3 + $0x148] sm:$0xff] }
 0x266   : > { %2254 = vmatpush1.bf16.msra.mxu0 %v2253_v42  ;;  %v1332_v62 = vmax.f32 %v1262_v50, 0.0  ;;  %v1079_v42 = vpop.permute.xlu1 %1078 }
 0x267   : > { %v1266_v54 = vpop.f32.mrb[46].mxu1  ;;  %2255 = vmatprep.subr.bf16.mxu0 %v2490_v5  ;;  %1511 = vperm.xlu0 %2355, %v2380_v44   ;;  %v1387_v44 = vld [vmem:[%s3631_s3 + $0x168] sm:$0xff] }
 0x268   : > { %v1267_v58 = vadd.f32 %v1266_v54, %v1051_v52  ;;  %v1268_v60 = vpop.f32.mrb[47].mxu1  ;;  %v2381_v52 = vld [vmem:[%s3633_s5 + $0x48] sm:$0xff] }
 0x269   : > { %1443 = vperm.xlu1 %2354, %v2381_v52   ;;  %v1391_v52 = vld [vmem:[%s3631_s3 + $0x188] sm:$0xff] }
 0x26a   : > { %v1333_v27 = vmax.f32 %v1267_v58, 0.0  ;;  %v2382_v58 = vld [vmem:[%s3633_s5 + $0x50] sm:$0xff] }
 0x26b   : > { %v1271_v43 = vpop.f32.mrb[48].mxu1  ;;  %1447 = vperm.xlu0 %2355, %v2382_v58   ;;  %v1392_v58 = vld [vmem:[%s3631_s3 + $0x190] sm:$0xff] }
 0x26c   : > { %v2256_v47 = vpack.c.bf16 %v1333_v27, %v1332_v62  ;;  %v1273_v16 = vpop.f32.mrb[49].mxu1  ;;  %v1272_v49 = vadd.f32 %v1271_v43, %v1055_v41  ;;  %v2383_v62 = vld [vmem:[%s3633_s5 + $0xd8] sm:$0xff]  ;;  %v2384_v27 = vld [vmem:[%s3633_s5 + $0xe0] sm:$0xff]  ;;  %v1344_v41 = vld [vmem:[%s3631_s3 + $0x10] sm:$0xff] }
 0x26d   : > { %1515 = vperm.xlu1 %2354, %v2383_v62   ;;  %v1342_v43 = vld [vmem:[%s3631_s3] sm:$0xff]  ;;  %v1397_v62 = vld [vmem:[%s3631_s3 + $0x1b8] sm:$0xff] }
 0x26e   : > { %2257 = vmatpush1.bf16.msra.mxu0 %v2256_v47  ;;  %v1334_v59 = vmax.f32 %v1272_v49, 0.0  ;;  %v2385_v47 = vld [vmem:[%s3633_s5 + $0x58] sm:$0xff]  ;;  %v2386_v16 = vld [vmem:[%s3633_s5 + $0x60] sm:$0xff]  ;;  %v2387_v49 = vld [vmem:[%s3633_s5 + $0xe8] sm:$0xff] }
 0x26f   : > { %v1276_v17 = vpop.f32.mrb[50].mxu1  ;;  %2258 = vmatprep.subr.bf16.mxu0 %v2490_v5  ;;  %1519 = vperm.xlu0 %2355, %v2384_v27   ;;  %v1399_v27 = vld [vmem:[%s3631_s3 + $0x1c8] sm:$0xff] }
 0x270   : > { %v1277_v20 = vadd.f32 %v1276_v17, %v1059_v33  ;;  %v1278_v55 = vpop.f32.mrb[51].mxu1  ;;  %v2388_v33 = vld [vmem:[%s3633_s5 + $0xf0] sm:$0xff]  ;;  %v1346_v17 = vld [vmem:[%s3631_s3 + $0x20] sm:$0xff] }
 0x271   : > { %1451 = vperm.xlu1 %2354, %v2385_v47   ;;  %v2390_v55 = vld [vmem:[%s3633_s5 + $0x70] sm:$0xff] }
 0x272   : > { %v1335_v18 = vmax.f32 %v1277_v20, 0.0  ;;  %v2389_v20 = vld [vmem:[%s3633_s5 + $0x68] sm:$0xff]  ;;  %v1400_v47 = vld [vmem:[%s3631_s3 + $0x1d0] sm:$0xff] }
 0x273   : > { %v1281_v61 = vpop.f32.mrb[52].mxu1  ;;  %1455 = vperm.xlu0 %2355, %v2386_v16   ;;  %v1403_v16 = vld [vmem:[%s3631_s3 + $0x1e8] sm:$0xff] }
 0x274   : > { %v2259_v2 = vpack.c.bf16 %v1335_v18, %v1334_v59  ;;  %v1283_v57 = vpop.f32.mrb[53].mxu1  ;;  %v1282_v22 = vadd.f32 %v1281_v61, %v1063_v24  ;;  %v1351_v59 = vld [vmem:[%s3631_s3 + $0x48] sm:$0xff]  ;;  %v2391_v18 = vld [vmem:[%s3633_s5 + $0xf8] sm:$0xff]  ;;  %v1350_v61 = vld [vmem:[%s3631_s3 + $0x40] sm:$0xff] }
 0x275   : > { %1523 = vperm.xlu1 %2354, %v2387_v49   ;;  %v1355_v57 = vld [vmem:[%s3631_s3 + $0x68] sm:$0xff]  ;;  %v1354_v24 = vld [vmem:[%s3631_s3 + $0x60] sm:$0xff]  ;;  %v1404_v49 = vld [vmem:[%s3631_s3 + $0x1f0] sm:$0xff] }
 0x276   : > { %2260 = vmatpush1.bf16.msra.mxu0 %v2259_v2  ;;  %v1336_v28 = vmax.f32 %v1282_v22, 0.0  ;;  %v2392_v2 = vld [vmem:[%s3633_s5 + $0x78] sm:$0xff]  ;;  %v1356_v22 = vld [vmem:[%s3631_s3 + $0x70] sm:$0xff] }
 0x277   : > { %v1286_v21 = vpop.f32.mrb[54].mxu1  ;;  %2261 = vmatprep.subr.bf16.mxu0 %v2490_v5  ;;  %1527 = vperm.xlu0 %2355, %v2388_v33  }
 0x278   : > { %v1287_v15 = vadd.f32 %v1286_v21, %v1067_v6  ;;  %v1288_v31 = vpop.f32.mrb[55].mxu1  ;;  %v1359_v6 = vld [vmem:[%s3631_s3 + $0x88] sm:$0xff]  ;;  %v1358_v21 = vld [vmem:[%s3631_s3 + $0x80] sm:$0xff] }
 0x279   : > { %1459 = vperm.xlu1 %2354, %v2389_v20   ;;  %v1363_v31 = vld [vmem:[%s3631_s3 + $0xa8] sm:$0xff] }
 0x27a   : > { %v1337_v13 = vmax.f32 %v1287_v15, 0.0  ;;  %v1360_v15 = vld [vmem:[%s3631_s3 + $0x90] sm:$0xff] }
 0x27b   : > { %v1291_v26 = vpop.f32.mrb[56].mxu1  ;;  %1463 = vperm.xlu0 %2355, %v2390_v55  }
 0x27c   : > { %v2262_v11 = vpack.c.bf16 %v1337_v13, %v1336_v28  ;;  %v1293_v3 = vpop.f32.mrb[57].mxu1  ;;  %v1292_v19 = vadd.f32 %v1291_v26, %v1071_v37  ;;  %v1365_v28 = vld [vmem:[%s3631_s3 + $0xb8] sm:$0xff]  ;;  %v1364_v13 = vld [vmem:[%s3631_s3 + $0xb0] sm:$0xff]  ;;  %v1367_v26 = vld [vmem:[%s3631_s3 + $0xc8] sm:$0xff] }
 0x27d   : > { %1531 = vperm.xlu1 %2354, %v2391_v18   ;;  %v1368_v3 = vld [vmem:[%s3631_s3 + $0xd0] sm:$0xff]  ;;  %v1371_v37 = vld [vmem:[%s3631_s3 + $0xe8] sm:$0xff] }
 0x27e   : > { %2263 = vmatpush1.bf16.msra.mxu0 %v2262_v11  ;;  %v1338_v9 = vmax.f32 %v1292_v19, 0.0  ;;  %v1369_v11 = vld [vmem:[%s3631_s3 + $0xd8] sm:$0xff] }
 0x27f   : > { %v1296_v45 = vpop.f32.mrb[58].mxu1  ;;  %2264 = vmatprep.subr.bf16.mxu0 %v2490_v5  ;;  %2356 = vset.pattern.permute.xlu0 %v2489_v1  ;;  %v1352_v1 = vld [vmem:[%s3631_s3 + $0x50] sm:$0xff]  ;;  %v1373_v19 = vld [vmem:[%s3631_s3 + $0xf8] sm:$0xff] }
 0x280   : > { %v1297_v12 = vadd.f32 %v1296_v45, %v1075_v25  ;;  %v1298_v63 = vpop.f32.mrb[59].mxu1  ;;  %v1372_v25 = vld [vmem:[%s3631_s3 + $0xf0] sm:$0xff]  ;;  %v1375_v45 = vld [vmem:[%s3631_s3 + $0x108] sm:$0xff] }
 0x281   : > { %1467 = vperm.xlu1 %2354, %v2392_v2   ;;  %v1376_v63 = vld [vmem:[%s3631_s3 + $0x110] sm:$0xff] }
 0x282   : > { %v1339_v36 = vmax.f32 %v1297_v12, 0.0  ;;  %v1377_v12 = vld [vmem:[%s3631_s3 + $0x118] sm:$0xff] }
 0x283   : > { %v1301_v34 = vpop.f32.mrb[60].mxu1 }
 0x284   : > { %v2265_v40 = vpack.c.bf16 %v1339_v36, %v1338_v9  ;;  %v1303_v38 = vpop.f32.mrb[61].mxu1  ;;  %v1302_v46 = vadd.f32 %v1301_v34, %v1079_v42  ;;  %v1378_v9 = vld [vmem:[%s3631_s3 + $0x120] sm:$0xff]  ;;  %v1381_v36 = vld [vmem:[%s3631_s3 + $0x138] sm:$0xff]  ;;  %v1380_v34 = vld [vmem:[%s3631_s3 + $0x130] sm:$0xff] }
 0x285   : > { %v1385_v38 = vld [vmem:[%s3631_s3 + $0x158] sm:$0xff]  ;;  %v1384_v42 = vld [vmem:[%s3631_s3 + $0x150] sm:$0xff] }
 0x286   : > { %2266 = vmatpush1.bf16.msra.mxu0 %v2265_v40  ;;  %v1340_v60 = vmax.f32 %v1302_v46, 0.0  ;;  %v1382_v40 = vld [vmem:[%s3631_s3 + $0x140] sm:$0xff] }
 0x287   : > { %v1306_v50 = vpop.f32.mrb[62].mxu1  ;;  %2267 = vmatprep.subr.bf16.mxu0 %v2490_v5  ;;  %v1386_v46 = vld [vmem:[%s3631_s3 + $0x160] sm:$0xff] }
 0x288   : > { %v1307_v54 = vadd.f32 %v1306_v50, %v1083_v48  ;;  %v1308_v56 = vpop.f32.mrb[63].mxu1  ;;  %v1389_v48 = vld [vmem:[%s3631_s3 + $0x178] sm:$0xff]  ;;  %v1388_v50 = vld [vmem:[%s3631_s3 + $0x170] sm:$0xff] }
 0x289   : > { %v1393_v56 = vld [vmem:[%s3631_s3 + $0x198] sm:$0xff] }
 0x28a   : > { %v1341_v0 = vmax.f32 %v1307_v54, 0.0  ;;  %v1390_v54 = vld [vmem:[%s3631_s3 + $0x180] sm:$0xff] }
 0x28c   : > { %v2268_v5 = vpack.c.bf16 %v1341_v0, %v1340_v60  ;;  %v1395_v60 = vld [vmem:[%s3631_s3 + $0x1a8] sm:$0xff]  ;;  %v1394_v0 = vld [vmem:[%s3631_s3 + $0x1a0] sm:$0xff] }
 0x28e   : > { %2269 = vmatpush1.bf16.msra.mxu0 %v2268_v5  ;;  %v1396_v5 = vld [vmem:[%s3631_s3 + $0x1b0] sm:$0xff] }
 0x291   : > { %1599 = vmatmul.mubr.f32.vlgmr.msra.gmra.mrb[32].mxu0 %v1342_v43  ;;  %v1398_v43 = vld [vmem:[%s3631_s3 + $0x1c0] sm:$0xff] }
 0x292   : > { %1603 = vmatprep.mubr.f32.mxu0 %v1345_v29  ;;  %v1401_v29 = vld [vmem:[%s3631_s3 + $0x1d8] sm:$0xff] }
 0x295   : > { %1604 = vmatmul.mubr.f32.gmra.mrb[34].mxu0 %v1344_v41  ;;  %v1402_v41 = vld [vmem:[%s3631_s3 + $0x1e0] sm:$0xff] }
 0x296   : > { %1608 = vmatprep.mubr.f32.mxu0 %v1347_v14  ;;  %v1405_v14 = vld [vmem:[%s3631_s3 + $0x1f8] sm:$0xff] }
 0x299   : > { %1609 = vmatmul.mubr.f32.gmra.mrb[36].mxu0 %v1346_v17 }
 0x29a   : > { %1613 = vmatprep.mubr.f32.mxu0 %v1349_v53 }
 0x29d   : > { %1614 = vmatmul.mubr.f32.gmra.mrb[38].mxu0 %v1348_v51 }
 0x29e   : > { %1618 = vmatprep.mubr.f32.mxu0 %v1351_v59 }
 0x2a1   : > { %1619 = vmatmul.mubr.f32.gmra.mrb[40].mxu0 %v1350_v61 }
 0x2a2   : > { %1623 = vmatprep.mubr.f32.mxu0 %v1353_v4 }
 0x2a5   : > { %1624 = vmatmul.mubr.f32.gmra.mrb[42].mxu0 %v1352_v1 }
 0x2a6   : > { %1628 = vmatprep.mubr.f32.mxu0 %v1355_v57 }
 0x2a9   : > { %1629 = vmatmul.mubr.f32.gmra.mrb[44].mxu0 %v1354_v24 }
 0x2aa   : > { %1633 = vmatprep.mubr.f32.mxu0 %v1357_v7 }
 0x2ad   : > { %1634 = vmatmul.mubr.f32.gmra.mrb[46].mxu0 %v1356_v22 }
 0x2ae   : > { %1638 = vmatprep.mubr.f32.mxu0 %v1359_v6  ;;  %v3477_v6 = vld.sshfl [vmem:[%s3632_s4] sm:$0x33 pattern:$0x76325410] }
 0x2b1   : > { %1639 = vmatmul.mubr.f32.gmra.mrb[48].mxu0 %v1358_v21 }
 0x2b2   : > { %1643 = vmatprep.mubr.f32.mxu0 %v1361_v35 }
 0x2b5   : > { %1644 = vmatmul.mubr.f32.gmra.mrb[50].mxu0 %v1360_v15  ;;  %v1806_v15 = vcombine.high %v3477_v6, %v3477_v6 }
 0x2b6   : > { %1648 = vmatprep.mubr.f32.mxu0 %v1363_v31  ;;  %v3460_v33 = vpop.permute.xlu1 %1471 }
 0x2b7   : > { %v3462_v53 = vpop.permute.xlu0 %1475  ;;  %1873 = vmatprep.mubr.f32.mxu1 %v1806_v15 }
 0x2b9   : > { %1649 = vmatmul.mubr.f32.gmra.mrb[52].mxu0 %v1362_v8 }
 0x2ba   : > { %1653 = vmatprep.mubr.f32.mxu0 %v1365_v28  ;;  %v1408_v17 = vpop.permute.xlu1 %1407 }
 0x2bd   : > { %1654 = vmatmul.mubr.f32.gmra.mrb[54].mxu0 %v1364_v13 }
 0x2be   : > { %1658 = vmatprep.mubr.f32.mxu0 %v1367_v26  ;;  %v3464_v55 = vpop.permute.xlu0 %1479  ;;  %v1792_v26 = vld [vmem:[%s3634_s6] sm:$0x3] }
 0x2bf   : > { %1795 = vperm.xlu0 %2356, %v1792_v26  }
 0x2c0   : > { %v1412_v20 = vpop.permute.xlu1 %1411 }
 0x2c1   : > { %1659 = vmatmul.mubr.f32.gmra.mrb[56].mxu0 %v1366_v23 }
 0x2c2   : > { %1663 = vmatprep.mubr.f32.mxu0 %v1369_v11  ;;  %v1416_v59 = vpop.permute.xlu0 %1415 }
 0x2c5   : > { %1664 = vmatmul.mubr.f32.gmra.mrb[58].mxu0 %v1368_v3 }
 0x2c6   : > { %1668 = vmatprep.mubr.f32.mxu0 %v1371_v37  ;;  %v3466_v51 = vpop.permute.xlu1 %1483 }
 0x2c8   : > { %v3468_v61 = vpop.permute.xlu0 %1487 }
 0x2c9   : > { %1669 = vmatmul.mubr.f32.gmra.mrb[60].mxu0 %v1370_v32 }
 0x2ca   : > { %1673 = vmatprep.mubr.f32.mxu0 %v1373_v19 }
 0x2cc   : > { %v1420_v18 = vpop.permute.xlu1 %1419 }
 0x2cd   : > { %1674 = vmatmul.mubr.f32.gmra.mrb[62].mxu0 %v1372_v25 }
 0x2ce   : > { %1678 = vmatprep.mubr.f32.mxu0 %v1375_v45  ;;  %v1424_v2 = vpop.permute.xlu0 %1423 }
 0x2d0   : > { %v3470_v4 = vpop.permute.xlu1 %1491 }
 0x2d1   : > { %1679 = vmatmul.mubr.f32.gmra.mrb[64].mxu0 %v1374_v30 }
 0x2d2   : > { %1683 = vmatprep.mubr.f32.mxu0 %v1377_v12 }
 0x2d4   : > { %v3472_v7 = vpop.permute.xlu0 %1495 }
 0x2d5   : > { %1684 = vmatmul.mubr.f32.gmra.mrb[66].mxu0 %v1376_v63  ;;  %v1428_v1 = vpop.permute.xlu1 %1427 }
 0x2d6   : > { %1688 = vmatprep.mubr.f32.mxu0 %v1379_v10 }
 0x2d8   : > { %v1432_v11 = vpop.permute.xlu0 %1431 }
 0x2d9   : > { %1689 = vmatmul.mubr.f32.gmra.mrb[68].mxu0 %v1378_v9 }
 0x2da   : > { %1693 = vmatprep.mubr.f32.mxu0 %v1381_v36 }
 0x2dc   : > { %v3479_v35 = vpop.permute.xlu1 %1499 }
 0x2dd   : > { %1694 = vmatmul.mubr.f32.gmra.mrb[70].mxu0 %v1380_v34  ;;  %v3488_v12 = vpop.permute.xlu0 %1503 }
 0x2de   : > { %1698 = vmatprep.mubr.f32.mxu0 %v1383_v39 }
 0x2e0   : > { %v1436_v32 = vpop.permute.xlu1 %1435 }
 0x2e1   : > { %1699 = vmatmul.mubr.f32.gmra.mrb[72].mxu0 %v1382_v40 }
 0x2e2   : > { %1703 = vmatprep.mubr.f32.mxu0 %v1385_v38 }
 0x2e4   : > { %v3490_v36 = vpop.permute.xlu1 %1507 }
 0x2e5   : > { %1704 = vmatmul.mubr.f32.gmra.mrb[74].mxu0 %v1384_v42  ;;  %v1440_v42 = vpop.permute.xlu0 %1439 }
 0x2e6   : > { %1708 = vmatprep.mubr.f32.mxu0 %v1387_v44 }
 0x2e9   : > { %1709 = vmatmul.mubr.f32.gmra.mrb[76].mxu0 %v1386_v46 }
 0x2ea   : > { %1713 = vmatprep.mubr.f32.mxu0 %v1389_v48  ;;  %v1444_v48 = vpop.permute.xlu1 %1443 }
 0x2ed   : > { %1714 = vmatmul.mubr.f32.gmra.mrb[78].mxu0 %v1388_v50 }
 0x2ee   : > { %1718 = vmatprep.mubr.f32.mxu0 %v1391_v52 }
 0x2f1   : > { %1719 = vmatmul.mubr.f32.gmra.mrb[80].mxu0 %v1390_v54 }
 0x2f2   : > { %1723 = vmatprep.mubr.f32.mxu0 %v1393_v56 }
 0x2f5   : > { %1724 = vmatmul.mubr.f32.gmra.mrb[82].mxu0 %v1392_v58 }
 0x2f6   : > { %1728 = vmatprep.mubr.f32.mxu0 %v1395_v60  ;;  %v3496_v60 = vpop.permute.xlu0 %1511 }
 0x2f9   : > { %1729 = vmatmul.mubr.f32.gmra.mrb[84].mxu0 %v1394_v0 }
 0x2fa   : > { %1733 = vmatprep.mubr.f32.mxu0 %v1397_v62 }
 0x2fd   : > { %1734 = vmatmul.mubr.f32.gmra.mrb[86].mxu0 %v1396_v5  ;;  %v3498_v5 = vpop.permute.xlu1 %1515 }
 0x2fe   : > { %1738 = vmatprep.mubr.f32.mxu0 %v1399_v27 }
 0x301   : > { %1739 = vmatmul.mubr.f32.gmra.mrb[88].mxu0 %v1398_v43 }
 0x302   : > { %1743 = vmatprep.mubr.f32.mxu0 %v1401_v29 }
 0x305   : > { %1744 = vmatmul.mubr.f32.gmra.mrb[90].mxu0 %v1400_v47 }
 0x306   : > { %1748 = vmatprep.mubr.f32.mxu0 %v1403_v16 }
 0x309   : > { %1749 = vmatmul.mubr.f32.gmra.mrb[92].mxu0 %v1402_v41  ;;  %v1448_v41 = vpop.permute.xlu0 %1447 }
 0x30a   : > { %1753 = vmatprep.mubr.f32.mxu0 %v1405_v14 }
 0x30d   : > { %1754 = vmatmul.mubr.f32.gmra.mrb[94].mxu0 %v1404_v49 }
 0x364   : > { %v1600_v57 = vpop.f32.mrb[32].mxu0 }
 0x365   : > { %v1602_v24 = vpop.f32.mrb[33].mxu0  ;;  %v1601_v22 = vadd.f32 %v1600_v57, %v1408_v17  ;;  %v1452_v17 = vpop.permute.xlu1 %1451 }
 0x367   : > { %v1759_v28 = vmax.f32 %v1601_v22, 0.0 }
 0x368   : > { %v1605_v21 = vpop.f32.mrb[34].mxu0 }
 0x369   : > { %v1606_v31 = vadd.f32 %v1605_v21, %v1412_v20  ;;  %v1607_v8 = vpop.f32.mrb[35].mxu0  ;;  %v3504_v21 = vpop.permute.xlu1 %1523 }
 0x36b   : > { %v1760_v13 = vmax.f32 %v1606_v31, 0.0 }
 0x36c   : > { %v1610_v23 = vpop.f32.mrb[36].mxu0 }
 0x36d   : > { %v3486_v3 = vpack.c.bf16 %v1760_v13, %v1759_v28  ;;  %v1612_v37 = vpop.f32.mrb[37].mxu0  ;;  %v1611_v19 = vadd.f32 %v1610_v23, %v1416_v59 }
 0x36f   : > { %v1761_v63 = vmax.f32 %v1611_v19, 0.0 }
 0x370   : > { %v1615_v25 = vpop.f32.mrb[38].mxu0 }
 0x371   : > { %v1616_v45 = vadd.f32 %v1615_v25, %v1420_v18  ;;  %v1617_v30 = vpop.f32.mrb[39].mxu0 }
 0x373   : > { %v1762_v10 = vmax.f32 %v1616_v45, 0.0 }
 0x374   : > { %v1620_v9 = vpop.f32.mrb[40].mxu0 }
 0x375   : > { %v3492_v34 = vpack.c.bf16 %v1762_v10, %v1761_v63  ;;  %v1622_v39 = vpop.f32.mrb[41].mxu0  ;;  %v1621_v40 = vadd.f32 %v1620_v9, %v1424_v2 }
 0x377   : > { %v1763_v50 = vmax.f32 %v1621_v40, 0.0 }
 0x378   : > { %v1625_v38 = vpop.f32.mrb[42].mxu0 }
 0x379   : > { %v1626_v44 = vadd.f32 %v1625_v38, %v1428_v1  ;;  %v1627_v46 = vpop.f32.mrb[43].mxu0  ;;  %v3502_v1 = vpop.permute.xlu0 %1519 }
 0x37b   : > { %v1764_v52 = vmax.f32 %v1626_v44, 0.0 }
 0x37c   : > { %v1630_v54 = vpop.f32.mrb[44].mxu0 }
 0x37d   : > { %v3494_v56 = vpack.c.bf16 %v1764_v52, %v1763_v50  ;;  %v1632_v58 = vpop.f32.mrb[45].mxu0  ;;  %v1631_v0 = vadd.f32 %v1630_v54, %v1432_v11  ;;  %v1456_v13 = vpop.permute.xlu0 %1455 }
 0x37e   : > { %v1460_v11 = vpop.permute.xlu1 %1459 }
 0x37f   : > { %v1765_v29 = vmax.f32 %v1631_v0, 0.0 }
 0x380   : > { %v1635_v62 = vpop.f32.mrb[46].mxu0 }
 0x381   : > { %v1636_v27 = vadd.f32 %v1635_v62, %v1436_v32  ;;  %v1637_v43 = vpop.f32.mrb[47].mxu0  ;;  %v3510_v30 = vpop.permute.xlu0 %1527 }
 0x382   : > { %v3512_v9 = vpop.permute.xlu1 %1531 }
 0x383   : > { %v1766_v47 = vmax.f32 %v1636_v27, 0.0 }
 0x384   : > { %v1640_v16 = vpop.f32.mrb[48].mxu0 }
 0x385   : > { %v3500_v14 = vpack.c.bf16 %v1766_v47, %v1765_v29  ;;  %v1642_v49 = vpop.f32.mrb[49].mxu0  ;;  %v1641_v20 = vadd.f32 %v1640_v16, %v1440_v42  ;;  %v1464_v44 = vpop.permute.xlu0 %1463 }
 0x386   : > { %v1468_v52 = vpop.permute.xlu1 %1467 }
 0x387   : > { %v1767_v57 = vmax.f32 %v1641_v20, 0.0 }
 0x388   : > { %v1645_v59 = vpop.f32.mrb[50].mxu0 }
 0x389   : > { %v1646_v18 = vadd.f32 %v1645_v59, %v1444_v48  ;;  %v1647_v2 = vpop.f32.mrb[51].mxu0 }
 0x38b   : > { %v1768_v24 = vmax.f32 %v1646_v18, 0.0 }
 0x38c   : > { %v1650_v22 = vpop.f32.mrb[52].mxu0 }
 0x38d   : > { %v3506_v15 = vpack.c.bf16 %v1768_v24, %v1767_v57  ;;  %v1652_v31 = vpop.f32.mrb[53].mxu0  ;;  %v1651_v8 = vadd.f32 %v1650_v22, %v1448_v41 }
 0x38f   : > { %v1769_v37 = vmax.f32 %v1651_v8, 0.0 }
 0x390   : > { %v1655_v28 = vpop.f32.mrb[54].mxu0 }
 0x391   : > { %v1656_v26 = vadd.f32 %v1655_v28, %v1452_v17  ;;  %v1657_v23 = vpop.f32.mrb[55].mxu0 }
 0x393   : > { %v1770_v32 = vmax.f32 %v1656_v26, 0.0 }
 0x394   : > { %v1660_v19 = vpop.f32.mrb[56].mxu0 }
 0x395   : > { %v3508_v25 = vpack.c.bf16 %v1770_v32, %v1769_v37  ;;  %v1662_v45 = vpop.f32.mrb[57].mxu0  ;;  %v1661_v63 = vadd.f32 %v1660_v19, %v1456_v13 }
 0x397   : > { %v1771_v38 = vmax.f32 %v1661_v63, 0.0 }
 0x398   : > { %v1665_v10 = vpop.f32.mrb[58].mxu0 }
 0x399   : > { %v1666_v39 = vadd.f32 %v1665_v10, %v1460_v11  ;;  %v1667_v40 = vpop.f32.mrb[59].mxu0 }
 0x39b   : > { %v1772_v42 = vmax.f32 %v1666_v39, 0.0 }
 0x39c   : > { %v1670_v46 = vpop.f32.mrb[60].mxu0 }
 0x39d   : > { %v3514_v48 = vpack.c.bf16 %v1772_v42, %v1771_v38  ;;  %v1672_v50 = vpop.f32.mrb[61].mxu0  ;;  %v1671_v54 = vadd.f32 %v1670_v46, %v1464_v44 }
 0x39f   : > { %v1773_v27 = vmax.f32 %v1671_v54, 0.0 }
 0x3a0   : > { %v1675_v58 = vpop.f32.mrb[62].mxu0 }
 0x3a1   : > { %v1676_v0 = vadd.f32 %v1675_v58, %v1468_v52  ;;  %v1677_v62 = vpop.f32.mrb[63].mxu0 }
 0x3a3   : > { %v1774_v43 = vmax.f32 %v1676_v0, 0.0 }
 0x3a4   : > { %v1680_v29 = vpop.f32.mrb[64].mxu0 }
 0x3a5   : > { %v3516_v47 = vpack.c.bf16 %v1774_v43, %v1773_v27  ;;  %v1682_v16 = vpop.f32.mrb[65].mxu0  ;;  %v1681_v41 = vadd.f32 %v1680_v29, %v3460_v33 }
 0x3a7   : > { %v1775_v59 = vmax.f32 %v1681_v41, 0.0 }
 0x3a8   : > { %v1685_v49 = vpop.f32.mrb[66].mxu0 }
 0x3a9   : > { %v1686_v17 = vadd.f32 %v1685_v49, %v3462_v53  ;;  %v1687_v20 = vpop.f32.mrb[67].mxu0 }
 0x3ab   : > { %v1776_v18 = vmax.f32 %v1686_v17, 0.0 }
 0x3ac   : > { %v1690_v2 = vpop.f32.mrb[68].mxu0 }
 0x3ad   : > { %v2270_v57 = vpack.c.bf16 %v1776_v18, %v1775_v59  ;;  %v1692_v24 = vpop.f32.mrb[69].mxu0  ;;  %v1691_v22 = vadd.f32 %v1690_v2, %v3464_v55 }
 0x3af   : > { %2271 = vmatprep.subr.bf16.mxu1 %v2270_v57  ;;  %v1777_v13 = vmax.f32 %v1691_v22, 0.0 }
 0x3b0   : > { %v1695_v31 = vpop.f32.mrb[70].mxu0  ;;  %2273 = vmatpush3.bf16.msra.mxu1 %v3486_v3 }
 0x3b1   : > { %v1696_v8 = vadd.f32 %v1695_v31, %v3466_v51  ;;  %v1697_v28 = vpop.f32.mrb[71].mxu0 }
 0x3b3   : > { %v1778_v33 = vmax.f32 %v1696_v8, 0.0 }
 0x3b4   : > { %v1700_v26 = vpop.f32.mrb[72].mxu0 }
 0x3b5   : > { %v2274_v23 = vpack.c.bf16 %v1778_v33, %v1777_v13  ;;  %v1702_v53 = vpop.f32.mrb[73].mxu0  ;;  %v1701_v11 = vadd.f32 %v1700_v26, %v3468_v61 }
 0x3b7   : > { %2275 = vmatprep.subr.bf16.mxu1 %v2274_v23  ;;  %v1779_v19 = vmax.f32 %v1701_v11, 0.0 }
 0x3b8   : > { %v1705_v37 = vpop.f32.mrb[74].mxu0  ;;  %2277 = vmatpush3.bf16.msra.mxu1 %v3492_v34 }
 0x3b9   : > { %v1706_v55 = vadd.f32 %v1705_v37, %v3470_v4  ;;  %v1707_v32 = vpop.f32.mrb[75].mxu0 }
 0x3bb   : > { %v1780_v45 = vmax.f32 %v1706_v55, 0.0 }
 0x3bc   : > { %v1710_v3 = vpop.f32.mrb[76].mxu0 }
 0x3bd   : > { %v2278_v63 = vpack.c.bf16 %v1780_v45, %v1779_v19  ;;  %v1712_v51 = vpop.f32.mrb[77].mxu0  ;;  %v1711_v10 = vadd.f32 %v1710_v3, %v3472_v7 }
 0x3bf   : > { %2279 = vmatprep.subr.bf16.mxu1 %v2278_v63  ;;  %v1781_v38 = vmax.f32 %v1711_v10, 0.0 }
 0x3c0   : > { %v1715_v39 = vpop.f32.mrb[78].mxu0  ;;  %2281 = vmatpush3.bf16.msra.mxu1 %v3494_v56 }
 0x3c1   : > { %v1716_v61 = vadd.f32 %v1715_v39, %v3479_v35  ;;  %v1717_v40 = vpop.f32.mrb[79].mxu0 }
 0x3c3   : > { %v1782_v42 = vmax.f32 %v1716_v61, 0.0 }
 0x3c4   : > { %v1720_v34 = vpop.f32.mrb[80].mxu0 }
 0x3c5   : > { %v2282_v44 = vpack.c.bf16 %v1782_v42, %v1781_v38  ;;  %v1722_v4 = vpop.f32.mrb[81].mxu0  ;;  %v1721_v46 = vadd.f32 %v1720_v34, %v3488_v12 }
 0x3c7   : > { %2283 = vmatprep.subr.bf16.mxu1 %v2282_v44  ;;  %v1783_v54 = vmax.f32 %v1721_v46, 0.0 }
 0x3c8   : > { %v1725_v50 = vpop.f32.mrb[82].mxu0  ;;  %2285 = vmatpush3.bf16.msra.mxu1 %v3500_v14 }
 0x3c9   : > { %v1726_v7 = vadd.f32 %v1725_v50, %v3490_v36  ;;  %v1727_v52 = vpop.f32.mrb[83].mxu0 }
 0x3cb   : > { %v1784_v58 = vmax.f32 %v1726_v7, 0.0 }
 0x3cc   : > { %v1730_v56 = vpop.f32.mrb[84].mxu0 }
 0x3cd   : > { %v2286_v0 = vpack.c.bf16 %v1784_v58, %v1783_v54  ;;  %v1732_v35 = vpop.f32.mrb[85].mxu0  ;;  %v1731_v62 = vadd.f32 %v1730_v56, %v3496_v60 }
 0x3cf   : > { %2287 = vmatprep.subr.bf16.mxu1 %v2286_v0  ;;  %v1785_v29 = vmax.f32 %v1731_v62, 0.0 }
 0x3d0   : > { %v1735_v27 = vpop.f32.mrb[86].mxu0  ;;  %2289 = vmatpush3.bf16.msra.mxu1 %v3506_v15 }
 0x3d1   : > { %v1736_v12 = vadd.f32 %v1735_v27, %v3498_v5  ;;  %v1737_v43 = vpop.f32.mrb[87].mxu0 }
 0x3d3   : > { %v1786_v16 = vmax.f32 %v1736_v12, 0.0 }
 0x3d4   : > { %v1740_v14 = vpop.f32.mrb[88].mxu0 }
 0x3d5   : > { %v2290_v41 = vpack.c.bf16 %v1786_v16, %v1785_v29  ;;  %v1742_v36 = vpop.f32.mrb[89].mxu0  ;;  %v1741_v49 = vadd.f32 %v1740_v14, %v3502_v1 }
 0x3d7   : > { %2291 = vmatprep.subr.bf16.mxu1 %v2290_v41  ;;  %v1787_v59 = vmax.f32 %v1741_v49, 0.0 }
 0x3d8   : > { %v1745_v17 = vpop.f32.mrb[90].mxu0  ;;  %2293 = vmatpush3.bf16.msra.mxu1 %v3508_v25 }
 0x3d9   : > { %v1746_v60 = vadd.f32 %v1745_v17, %v3504_v21  ;;  %v1747_v20 = vpop.f32.mrb[91].mxu0 }
 0x3db   : > { %v1788_v18 = vmax.f32 %v1746_v60, 0.0 }
 0x3dc   : > { %v1750_v15 = vpop.f32.mrb[92].mxu0 }
 0x3dd   : > { %v2294_v5 = vpack.c.bf16 %v1788_v18, %v1787_v59  ;;  %v1752_v2 = vpop.f32.mrb[93].mxu0  ;;  %v1751_v57 = vadd.f32 %v1750_v15, %v3510_v30 }
 0x3df   : > { %2295 = vmatprep.subr.bf16.mxu1 %v2294_v5  ;;  %v1789_v25 = vmax.f32 %v1751_v57, 0.0 }
 0x3e0   : > { %v1755_v24 = vpop.f32.mrb[94].mxu0  ;;  %2297 = vmatpush3.bf16.msra.mxu1 %v3514_v48  ;;  %v1796_v48 = vpop.permute.xlu0 %1795 }
 0x3e1   : > { %v1756_v1 = vadd.f32 %v1755_v24, %v3512_v9  ;;  %v1757_v22 = vpop.f32.mrb[95].mxu0 }
 0x3e3   : > { %v1790_v21 = vmax.f32 %v1756_v1, 0.0 }
 0x3e5   : > { %v2298_v31 = vpack.c.bf16 %v1790_v21, %v1789_v25 }
 0x3e7   : > { %2299 = vmatprep.subr.bf16.mxu1 %v2298_v31 }
 0x3e8   : > { %2301 = vmatpush3.bf16.msra.mxu1 %v3516_v47 }
 0x3eb   : > { %1874 = vmatmul.mubr.f32.vlgmr.msra.gmra.mrb[64].mxu1 %v3477_v6 }
 0x4be   : > { %v2121_v30 = vpop.f32.mrb[64].mxu1 }
 0x4bf   : > { %v2122_v8 = vpop.f32.mrb[65].mxu1 }
 0x4c0   : > { %v2123_v9 = vadd.f32 %v2122_v8, %v2121_v30 }
 0x4c2   : > { %v1876_v28 = vadd.f32 %v2123_v9, %v1796_v48 }
 0x4c4   : > { %v1881_v6 = vsub.f32 0.0, %v1876_v28  ;;  %1879 = vst [vmem:[%s299_s21] sm:$0x1] %v1876_v28 }
 0x4c5   : > { %2406 = shalt.err (!%p2403_p3)
}
 0x4c6   : > { %s2407_s18 = scalar_lea.hbm %s3553_s25, 16  ;;  %s2411_s24 = scalar_lea.hbm %s3635_s7, 32 }
 0x4c7   : > { %p2408_p4 = scmp.ne.s32.totalorder %s3553_s25, %s2407_s18  ;;  %p2412_p9 = scmp.lt.u32.totalorder %s3553_s25, %s3635_s7 }
 0x4c8   : > { %p2413_p10 = scmp.lt.u32.totalorder %s2411_s24, %s2407_s18  ;;  %p2415_p12 = scmp.lt.u32.totalorder %s2407_s18, %s3553_s25 }
 0x4c9   : > { %p2409_p7 = pnand %p2408_p4, %p2578_p5 }
 0x4ca   : > { %p2414_p11 = por %p2413_p10, %p2412_p9 }
 0x4cb   : > { %p2410_p8 = pneg %p2409_p7 }
 0x4cc   : > { %p2416_p13 = por %p2415_p12, %p2414_p11 }
 0x4ce   : > { %p2417_p0 = pnand %p2416_p13, %p2410_p8 }
 0x4d0   : > { %2420 = shalt.err (!%p2417_p0)
}
 0x4d1   : > { %2302 = dma.vmem_to_hbm [thread:$0]  (%p2578_p5), %s3555_s22, 16, %s3553_s25, %s1901_s26   ;;  %v1884_v47 = vand.u32 2147483647, %v1881_v6  ;;  %v1880_v45 = vmax.f32 %v1876_v28, 0.0  ;;  %vm1882_vm3 = vcmp.ne.f32.partialorder %v1881_v6, %v1881_v6 }
 0x4d2   : > { %s305_s22 = scalar_lea.vmem [#allocation4], %s3544_s19  ;;  %s3585_s17 = scalar_lea.hbm %s3636_s8, %s2052_s20 }
 0x4d3   : > { %v1885_v13 = vsub.f32 0.0, %v1884_v47  ;;  %s1930_s25 = sshll.u32 %s305_s22, 4  ;;  %s1905_s18 = scalar_lea.sflag [#allocation5], %s3544_s19  ;;  %s3587_s25 = int_to_ptr.vmem [resolvable:$true] %s1930_s25 }
 0x4d4   : > { %s2421_s21 = scalar_lea.vmem %s3587_s25, 16  ;;  %s2494_s23 = smov [#allocation4]  }
 0x4d5   : > { %v1886_v33 = vmul.f32 1.442695, %v1885_v13  ;;  %p2422_p1 = scmp.ne.s32.totalorder %s3587_s25, %s2421_s21  ;;  %s2425_s9 = sshll.u32 %s2494_s23, 4  ;;  %s2426_s9 = int_to_ptr.vmem [resolvable:$false] %s2425_s9 }
 0x4d6   : > { %s2427_s24 = scalar_lea.vmem %s2426_s9, 32  ;;  %p2428_p4 = scmp.lt.s32.totalorder %s3587_s25, %s2426_s9 }
 0x4d7   : > { %2357 = vpow2.f32 %v1886_v33  ;;  %p2423_p2 = pnand %p2422_p1, %p2578_p5  ;;  %p2429_p7 = scmp.lt.s32.totalorder %s2427_s24, %s2421_s21 }
 0x4d9   : > { %p2424_p3 = pneg %p2423_p2  ;;  %p2430_p8 = por %p2429_p7, %p2428_p4 }
 0x4db   : > { %p2431_p9 = pnand %p2430_p8, %p2424_p3 }
 0x4e1   : > { %v2358_v26 = vpop.eup %2357 }
 0x4e2   : > { %v1888_v23 = vadd.f32 1.0, %v2358_v26  ;;  %v1891_v53 = vmul.f32 -0.5, %v2358_v26  ;;  %v1894_v37 = vand.u32 2147483647, %v2358_v26 }
 0x4e4   : > { %2359 = vlog2.f32 %v1888_v23  ;;  %v1892_v11 = vadd.f32 1.0, %v1891_v53  ;;  %vm1895_vm2 = vcmp.lt.f32.partialorder %v1894_v37, 0.0004427343 }
 0x4e6   : > { %v1893_v19 = vmul.f32 %v2358_v26, %v1892_v11 }
 0x4ee   : > { %v2360_v55 = vpop.eup %2359 }
 0x4ef   : > { %v1890_v32 = vmul.f32 0.6931472, %v2360_v55 }
 0x4f1   : > { %v1896_v3 = vsel %vm1895_vm2, %v1893_v19, %v1890_v32 }
 0x4f2   : > { %v1897_v63 = vadd.f32 %v1896_v3, %v1880_v45 }
 0x4f4   : > { %v1898_v51 = vsel %vm1882_vm3, %v1876_v28, %v1897_v63 }
 0x4f5   : > { %1899 = vst [vmem:[%s305_s22 - $0x1] sm:$0x2] %v1898_v51 }
 0x4f6   : > { %2434 = shalt.err (!%p2431_p9)
}
 0x4f7   : > { %s2435_s19 = scalar_lea.hbm %s3585_s17, 16  ;;  %s2439_s13 = scalar_lea.hbm %s3636_s8, 32 }
 0x4f8   : > { %p2436_p10 = scmp.ne.s32.totalorder %s3585_s17, %s2435_s19  ;;  %p2440_p13 = scmp.lt.u32.totalorder %s3585_s17, %s3636_s8 }
 0x4f9   : > { %p2441_p0 = scmp.lt.u32.totalorder %s2439_s13, %s2435_s19  ;;  %p2443_p2 = scmp.lt.u32.totalorder %s2435_s19, %s3585_s17 }
 0x4fa   : > { %p2437_p11 = pnand %p2436_p10, %p2578_p5 }
 0x4fb   : > { %p2442_p1 = por %p2441_p0, %p2440_p13 }
 0x4fc   : > { %p2438_p12 = pneg %p2437_p11 }
 0x4fd   : > { %p2444_p3 = por %p2443_p2, %p2442_p1 }
 0x4ff   : > { %p2445_p4 = pnand %p2444_p3, %p2438_p12 }
 0x501   : > { %2448 = shalt.err (!%p2445_p4)
}
 0x502   : > { %2303 = dma.vmem_to_hbm [thread:$0]  (%p2578_p5), %s3587_s25, 16, %s3585_s17, %s1905_s18  }
 0x503 PF: > { %p2313_p7 = scmp.ge.s32.totalorder %s2487_s30, 2  ;;  %s1942_s10 = sand.u32 1, %s2475_s27  }
 0x504   : > { %s1943_s21 = scalar_lea.sflag [#allocation3], %s1942_s10 }
 0x505   : > { %p2307_p8 = pnand %p2313_p7, %p2582_p6 }
 0x507   : > { %2466 = dma.done.wait (!%p2307_p8), %s1943_s21, 16  }
 0x508   : > { %2468 = vsyncadd (!%p2307_p8), %s1943_s21, 4294967280  ;;  %s1951_s23 = scalar_lea.sflag [#allocation5], %s1942_s10 }
 0x509   : > { %2470 = dma.done.wait (!%p2307_p8), %s1951_s23, 16  }
 0x50a   : > { %2472 = vsyncadd (!%p2307_p8), %s1951_s23, 4294967280  ;;  %p22_p5 = scmp.ge.s32.totalorder %s2565_s11, 4   ;;  %s3639_s27 = smov %s2479_s28 }
 0x50b   : > { %s3640_s28 = smov %s2483_s29  ;;  %s3641_s29 = smov %s2576_s14 }
 0x50c   : > { %s3642_s30 = smov %s2565_s11  ;;  %24 = sbr.rel (!%p22_p5) target bundleno = 5 (0x5), region = 100 }
 0x513   :  { %1955 = vsyncpa [#allocation3], 1 }
 0x514   :  { %1957 = vsyncpa [#allocation3 + $0x1], 1 }
 0x515   :  { %1958 = vsyncpa [#allocation5], 1 }
 0x516   :  { %1960 = vsyncpa [#allocation5 + $0x1], 1 }

</bundles_post_ra>
